<compile_context>
chip_gen: v7x
topology: tpu7x:2x2x1
jax: 0.10.0
libtpu: 0.0.40
codegen_flags: <defaults>
</compile_context>

<pallas_src>
import numpy as np
import jax
import jax.numpy as jnp
from jax.experimental import pallas as pl
from jax.experimental.pallas import tpu as pltpu

EXPANSION = 4
BN_EPS = 1e-5
PAD_L = 8  # sublane-aligned column offset of the h1 interior inside the padded scratch


# -----------------------------------------------------------------------------
# Pallas kernel (one batch element per grid step).
# -----------------------------------------------------------------------------
def _make_bottleneck_kernel(H, W, stride, has_proj, h1_dtype):
    """Build the fused Bottleneck kernel for a static (shape, stride, shortcut) config."""
    S = stride
    Ho, Wo = H // S, W // S

    def kernel(*refs):
        if has_proj:
            (x_ref, w1_ref, s1_ref, b1_ref, w2_ref, s2_ref, b2_ref,
             w3_ref, s3_ref, b3_ref, ws_ref, ss_ref, bs_ref,
             o_ref, h1p_ref, slab_ref) = refs
        else:
            (x_ref, w1_ref, s1_ref, b1_ref, w2_ref, s2_ref, b2_ref,
             w3_ref, s3_ref, b3_ref,
             o_ref, h1p_ref, slab_ref) = refs
            ws_ref = ss_ref = bs_ref = None

        Cin = x_ref.shape[-1]
        P = w1_ref.shape[1]
        W_pad = h1p_ref.shape[1]

        # ---- conv1 (1x1) + bn1 + relu, computed ONCE --------------------------
        xv = x_ref[...]
        x2d = xv.reshape(H * W, Cin)
        h1 = jnp.dot(x2d.astype(jnp.bfloat16), w1_ref[...],
                     preferred_element_type=jnp.float32)
        h1 = jnp.maximum(h1 * s1_ref[...] + b1_ref[...], 0.0)

        # Zero only the halo ring (the interior is fully overwritten every step).
        zrow = jnp.zeros((1, W_pad, P), h1_dtype)
        h1p_ref[0:1] = zrow                                   # top padding row
        h1p_ref[H + 1:H + 2] = zrow                           # bottom padding row
        zcol = jnp.zeros((H, 2, P), h1_dtype)
        h1p_ref[1:H + 1, PAD_L - 2:PAD_L, :] = zcol           # left padding column
        h1p_ref[1:H + 1, PAD_L + W:PAD_L + W + 2, :] = zcol   # right padding column
        # Interior write is sublane-aligned (column offset PAD_L = 8).
        h1p_ref[1:1 + H, PAD_L:PAD_L + W, :] = h1.reshape(H, W, P).astype(h1_dtype)

        # ---- conv2 (3x3, stride S, padding 1): bf16 im2col slab + one K=9P dot --
        for di in range(3):
            for dj in range(3):
                k = di * 3 + dj
                c0 = PAD_L - 1 + dj
                if S == 1:
                    win = h1p_ref[di:di + Ho, c0:c0 + Wo, :]
                else:
                    win = h1p_ref[pl.ds(di, Ho, stride=S),
                                  pl.ds(c0, Wo, stride=S), :]
                slab_ref[:, k * P:(k + 1) * P] = (
                    win.reshape(Ho * Wo, P).astype(jnp.bfloat16))

        h2 = jnp.dot(slab_ref[...], w2_ref[...], preferred_element_type=jnp.float32)
        h2 = jnp.maximum(h2 * s2_ref[...] + b2_ref[...], 0.0)

        # ---- conv3 (1x1) + bn3 --------------------------------------------------
        h3 = jnp.dot(h2.astype(jnp.bfloat16), w3_ref[...],
                     preferred_element_type=jnp.float32)
        h3 = h3 * s3_ref[...] + b3_ref[...]

        # ---- shortcut -----------------------------------------------------------
        if S == 1:
            xs2d = x2d
        else:
            xs = x_ref[pl.ds(0, Ho, stride=S), pl.ds(0, Wo, stride=S), :]
            xs2d = xs.reshape(Ho * Wo, Cin)
        if has_proj:                       # strided 1x1 conv + bn
            sh = jnp.dot(xs2d.astype(jnp.bfloat16), ws_ref[...],
                         preferred_element_type=jnp.float32)
            sh = sh * ss_ref[...] + bs_ref[...]
        else:                              # identity fast path (stride==1, Cin==C4)
            sh = xs2d.astype(jnp.float32)

        # ---- residual add + final relu, flattened (Ho*Wo, C4) bf16 output ------
        o_ref[...] = jnp.maximum(h3 + sh, 0.0).astype(o_ref.dtype)

    return kernel


# -----------------------------------------------------------------------------
# Glue: parameter setup, BN folding, layout plumbing.
# -----------------------------------------------------------------------------
def _fold_bn(p):
    gamma, beta, mean, var = p
    scale = gamma / jnp.sqrt(var + BN_EPS)
    return (scale.reshape(1, -1).astype(jnp.float32),
            (beta - mean * scale).reshape(1, -1).astype(jnp.float32))


def init_params(key, in_planes, planes, stride):
    """Deterministic synthetic parameters (PyTorch OIHW conv layout, per-channel BN)."""
    out_planes = EXPANSION * planes
    ks = jax.random.split(key, 8)

    def conv_w(k, co, ci, kh, kw):
        fan_in = ci * kh * kw
        return jax.random.normal(k, (co, ci, kh, kw), jnp.float32) / np.sqrt(fan_in)

    def bn_p(k, c):
        k1, k2, k3, k4 = jax.random.split(k, 4)
        gamma = 1.0 + 0.1 * jax.random.normal(k1, (c,), jnp.float32)
        beta = 0.1 * jax.random.normal(k2, (c,), jnp.float32)
        mean = 0.1 * jax.random.normal(k3, (c,), jnp.float32)
        var = jax.random.uniform(k4, (c,), jnp.float32, minval=0.5, maxval=1.5)
        return gamma, beta, mean, var

    params = {
        "w1": conv_w(ks[0], planes, in_planes, 1, 1),
        "bn1": bn_p(ks[1], planes),
        "w2": conv_w(ks[2], planes, planes, 3, 3),
        "bn2": bn_p(ks[3], planes),
        "w3": conv_w(ks[4], out_planes, planes, 1, 1),
        "bn3": bn_p(ks[5], out_planes),
    }
    if stride != 1 or in_planes != out_planes:
        params["ws"] = conv_w(ks[6], out_planes, in_planes, 1, 1)
        params["bns"] = bn_p(ks[7], out_planes)
    return params


def bottleneck_pallas_nhwc(x_nhwc, params, stride):
    """NHWC-native entry point (use this when chaining blocks)."""
    N, H, W, Cin = x_nhwc.shape
    assert H % stride == 0 and W % stride == 0
    P = params["w1"].shape[0]
    C4 = params["w3"].shape[0]
    Ho, Wo = H // stride, W // stride
    has_proj = "ws" in params
    if not has_proj:
        assert stride == 1 and Cin == C4, \
            "identity shortcut requires stride == 1 and Cin == expansion * planes"

    # Activation / h1-scratch dtype: bf16 for stride==1 (halves HBM + VMEM bytes);
    # f32 on the stride>1 path so sublane-strided loads stay on 32-bit data.
    act_dtype = jnp.bfloat16 if stride == 1 else jnp.float32
    x = x_nhwc.astype(act_dtype)

    w1 = jnp.transpose(params["w1"][:, :, 0, 0]).astype(jnp.bfloat16)            # (Cin, P)
    w2 = (jnp.transpose(params["w2"], (2, 3, 1, 0))
          .reshape(9 * P, P).astype(jnp.bfloat16))                               # (9P, P)
    w3 = jnp.transpose(params["w3"][:, :, 0, 0]).astype(jnp.bfloat16)            # (P, C4)
    s1, b1 = _fold_bn(params["bn1"])
    s2, b2 = _fold_bn(params["bn2"])
    s3, b3 = _fold_bn(params["bn3"])

    def full_spec(a):
        return pl.BlockSpec(a.shape, lambda n, _nd=a.ndim: (0,) * _nd)

    in_arrays = [x, w1, s1, b1, w2, s2, b2, w3, s3, b3]
    in_specs = [pl.BlockSpec((None, H, W, Cin), lambda n: (n, 0, 0, 0))]
    in_specs += [full_spec(a) for a in in_arrays[1:]]

    if has_proj:
        ws = jnp.transpose(params["ws"][:, :, 0, 0]).astype(jnp.bfloat16)        # (Cin, C4)
        ss, bs = _fold_bn(params["bns"])
        in_arrays += [ws, ss, bs]
        in_specs += [full_spec(ws), full_spec(ss), full_spec(bs)]

    W_pad = W + 2 * PAD_L
    kernel = _make_bottleneck_kernel(H, W, stride, has_proj, act_dtype)
    out = pl.pallas_call(
        kernel,
        grid=(N,),
        in_specs=in_specs,
        out_specs=pl.BlockSpec((None, Ho * Wo, C4), lambda n: (n, 0, 0)),
        out_shape=jax.ShapeDtypeStruct((N, Ho * Wo, C4), jnp.bfloat16),
        scratch_shapes=[pltpu.VMEM((H + 2, W_pad, P), act_dtype),   # padded h1
                        pltpu.VMEM((Ho * Wo, 9 * P), jnp.bfloat16)],  # im2col slab
        compiler_params=pltpu.CompilerParams(
            dimension_semantics=("parallel",)),
    )(*in_arrays)

    return out.reshape(N, Ho, Wo, C4)


def bottleneck_pallas(x_nchw, params, stride):
    # NCHW <-> NHWC glue for parity with the PyTorch module interface only.
    # For chained blocks call bottleneck_pallas_nhwc directly and keep activations
    # NHWC/bf16 end-to-end (avoids two full-activation HBM transposes per block).
    x = jnp.transpose(x_nchw, (0, 2, 3, 1))
    out = bottleneck_pallas_nhwc(x, params, stride)
    return jnp.transpose(out, (0, 3, 1, 2))        # back to NCHW (bf16)


# -----------------------------------------------------------------------------
# Pure-JAX reference (NCHW, inference-mode BN) for validation.
# -----------------------------------------------------------------------------
def _conv2d_ref(x, w, stride, padding):
    return jax.lax.conv_general_dilated(
        x, w, window_strides=(stride, stride),
        padding=[(padding, padding), (padding, padding)],
        dimension_numbers=("NCHW", "OIHW", "NCHW"),
        precision=jax.lax.Precision.HIGHEST)


def _bn_ref(x, p):
    gamma, beta, mean, var = p
    s = gamma / jnp.sqrt(var + BN_EPS)
    return x * s[None, :, None, None] + (beta - mean * s)[None, :, None, None]


def bottleneck_ref(x, params, stride):
    out = jax.nn.relu(_bn_ref(_conv2d_ref(x, params["w1"], 1, 0), params["bn1"]))
    out = jax.nn.relu(_bn_ref(_conv2d_ref(out, params["w2"], stride, 1), params["bn2"]))
    out = _bn_ref(_conv2d_ref(out, params["w3"], 1, 0), params["bn3"])
    if "ws" in params:
        sc = _bn_ref(_conv2d_ref(x, params["ws"], stride, 0), params["bns"])
    else:
        sc = x
    return jax.nn.relu(out + sc)


if __name__ == "__main__":
    key = jax.random.PRNGKey(0)
    configs = [
        # (N, in_planes, H, W, planes, stride)
        (2, 4, 16, 16, 4, 2),    # projection shortcut, stride 2 (f32 activation path)
        (2, 16, 16, 16, 4, 1),   # identity shortcut, stride 1 (bf16 activation path)
        (2, 8, 16, 16, 4, 1),    # projection shortcut, stride 1 (bf16 activation path)
    ]
    for N, cin, H, W, planes, stride in configs:
        key, kx, kp = jax.random.split(key, 3)
        x = jax.random.normal(kx, (N, cin, H, W), jnp.float32)
        params = init_params(kp, cin, planes, stride)

        out = jax.block_until_ready(bottleneck_pallas(x, params, stride))
        ref = jax.block_until_ready(bottleneck_ref(x, params, stride))

        assert out.shape == ref.shape, (out.shape, ref.shape)
        err = float(jnp.max(jnp.abs(out.astype(jnp.float32) - ref)))
        scale = float(jnp.max(jnp.abs(ref))) + 1.0
        # bf16 MXU operands / bf16 activation I/O vs HIGHEST-precision f32 reference:
        # loose enough for the precision change, tight against real bugs.
        if not err / scale < 4e-2:
            raise AssertionError(
                f"kernel mismatch (cfg={(N, cin, H, W, planes, stride)}): "
                f"max_abs_err={err}, ref_scale={scale}")

    print("KERNEL_OK")
</pallas_src>

<mosaic_0001>
module attributes {stable_mosaic.version = 11 : i64} {
  func.func @kernel(%arg0: i32, %arg1: memref<1x16x16x4xf32, #tpu.memory_space<vmem>>, %arg2: memref<4x4xbf16, #tpu.memory_space<vmem>>, %arg3: memref<1x4xf32, #tpu.memory_space<vmem>>, %arg4: memref<1x4xf32, #tpu.memory_space<vmem>>, %arg5: memref<36x4xbf16, #tpu.memory_space<vmem>>, %arg6: memref<1x4xf32, #tpu.memory_space<vmem>>, %arg7: memref<1x4xf32, #tpu.memory_space<vmem>>, %arg8: memref<4x16xbf16, #tpu.memory_space<vmem>>, %arg9: memref<1x16xf32, #tpu.memory_space<vmem>>, %arg10: memref<1x16xf32, #tpu.memory_space<vmem>>, %arg11: memref<4x16xbf16, #tpu.memory_space<vmem>>, %arg12: memref<1x16xf32, #tpu.memory_space<vmem>>, %arg13: memref<1x16xf32, #tpu.memory_space<vmem>>, %arg14: memref<1x64x16xbf16, #tpu.memory_space<vmem>>, %arg15: memref<18x32x4xf32, #tpu.memory_space<vmem>>, %arg16: memref<64x36xbf16, #tpu.memory_space<vmem>>) attributes {dimension_semantics = [#tpu.dimension_semantics<parallel>], iteration_bounds = array<i64: 2>, scalar_prefetch = 0 : i64, scratch_operands = 2 : i64, tpu.core_type = #tpu.core_type<tc>, window_params = [{transform_indices = @transform_0, window_bounds = array<i64: 1, 16, 16, 4>}, {pipeline_mode = #tpu.pipeline_mode<synchronous>, transform_indices = @transform_1, window_bounds = array<i64: 4, 4>}, {pipeline_mode = #tpu.pipeline_mode<synchronous>, transform_indices = @transform_2, window_bounds = array<i64: 1, 4>}, {pipeline_mode = #tpu.pipeline_mode<synchronous>, transform_indices = @transform_3, window_bounds = array<i64: 1, 4>}, {pipeline_mode = #tpu.pipeline_mode<synchronous>, transform_indices = @transform_4, window_bounds = array<i64: 36, 4>}, {pipeline_mode = #tpu.pipeline_mode<synchronous>, transform_indices = @transform_5, window_bounds = array<i64: 1, 4>}, {pipeline_mode = #tpu.pipeline_mode<synchronous>, transform_indices = @transform_6, window_bounds = array<i64: 1, 4>}, {pipeline_mode = #tpu.pipeline_mode<synchronous>, transform_indices = @transform_7, window_bounds = array<i64: 4, 16>}, {pipeline_mode = #tpu.pipeline_mode<synchronous>, transform_indices = @transform_8, window_bounds = array<i64: 1, 16>}, {pipeline_mode = #tpu.pipeline_mode<synchronous>, transform_indices = @transform_9, window_bounds = array<i64: 1, 16>}, {pipeline_mode = #tpu.pipeline_mode<synchronous>, transform_indices = @transform_10, window_bounds = array<i64: 4, 16>}, {pipeline_mode = #tpu.pipeline_mode<synchronous>, transform_indices = @transform_11, window_bounds = array<i64: 1, 16>}, {pipeline_mode = #tpu.pipeline_mode<synchronous>, transform_indices = @transform_12, window_bounds = array<i64: 1, 16>}, {transform_indices = @transform_13, window_bounds = array<i64: 1, 64, 16>}]} {
    %c0 = arith.constant 0 : index
    %c0_0 = arith.constant 0 : index
    %c0_1 = arith.constant 0 : index
    %c0_2 = arith.constant 0 : index
    %0 = vector.load %arg1[%c0, %c0_0, %c0_1, %c0_2] : memref<1x16x16x4xf32, #tpu.memory_space<vmem>>, vector<1x16x16x4xf32>
    %1 = vector.shape_cast %0 : vector<1x16x16x4xf32> to vector<16x16x4xf32>
    %2 = vector.shape_cast %1 : vector<16x16x4xf32> to vector<256x4xf32>
    %3 = arith.truncf %2 : vector<256x4xf32> to vector<256x4xbf16>
    %c0_3 = arith.constant 0 : index
    %c0_4 = arith.constant 0 : index
    %4 = vector.load %arg2[%c0_3, %c0_4] : memref<4x4xbf16, #tpu.memory_space<vmem>>, vector<4x4xbf16>
    %cst = arith.constant dense<0.000000e+00> : vector<256x4xf32>
    %5 = tpu.matmul %3, %4, %cst {dimension_numbers = #tpu.dot_dimension_numbers<[1], [0], [0], [1], [0, 0, 1, 1], [], []>} : vector<256x4xbf16>, vector<4x4xbf16>, vector<256x4xf32> -> vector<256x4xf32>
    %c0_5 = arith.constant 0 : index
    %c0_6 = arith.constant 0 : index
    %6 = vector.load %arg3[%c0_5, %c0_6] : memref<1x4xf32, #tpu.memory_space<vmem>>, vector<1x4xf32>
    %7 = vector.broadcast %6 : vector<1x4xf32> to vector<256x4xf32>
    %8 = arith.mulf %5, %7 : vector<256x4xf32>
    %c0_7 = arith.constant 0 : index
    %c0_8 = arith.constant 0 : index
    %9 = vector.load %arg4[%c0_7, %c0_8] : memref<1x4xf32, #tpu.memory_space<vmem>>, vector<1x4xf32>
    %10 = vector.broadcast %9 : vector<1x4xf32> to vector<256x4xf32>
    %11 = arith.addf %8, %10 : vector<256x4xf32>
    %cst_9 = arith.constant 0.000000e+00 : f32
    %12 = vector.broadcast %cst_9 : f32 to vector<256x4xf32>
    %13 = arith.maximumf %11, %12 : vector<256x4xf32>
    %cst_10 = arith.constant 0.000000e+00 : f32
    %14 = vector.broadcast %cst_10 : f32 to vector<1x32x4xf32>
    %c0_11 = arith.constant 0 : index
    %c0_12 = arith.constant 0 : index
    %c0_13 = arith.constant 0 : index
    %15 = vector.load %arg15[%c0_11, %c0_12, %c0_13] : memref<18x32x4xf32, #tpu.memory_space<vmem>>, vector<1x32x4xf32>
    tpu.vector_store %arg15[%c0_11, %c0_12, %c0_13], %14 {strides = array<i32>} : memref<18x32x4xf32, #tpu.memory_space<vmem>>, vector<1x32x4xf32>,
    %c17 = arith.constant 17 : index
    %c0_14 = arith.constant 0 : index
    %c0_15 = arith.constant 0 : index
    %16 = vector.load %arg15[%c17, %c0_14, %c0_15] : memref<18x32x4xf32, #tpu.memory_space<vmem>>, vector<1x32x4xf32>
    tpu.vector_store %arg15[%c17, %c0_14, %c0_15], %14 {strides = array<i32>} : memref<18x32x4xf32, #tpu.memory_space<vmem>>, vector<1x32x4xf32>,
    %cst_16 = arith.constant 0.000000e+00 : f32
    %17 = vector.broadcast %cst_16 : f32 to vector<16x2x4xf32>
    %c1 = arith.constant 1 : index
    %c6 = arith.constant 6 : index
    %c0_17 = arith.constant 0 : index
    %18 = vector.load %arg15[%c1, %c6, %c0_17] : memref<18x32x4xf32, #tpu.memory_space<vmem>>, vector<16x2x4xf32>
    tpu.vector_store %arg15[%c1, %c6, %c0_17], %17 {strides = array<i32>} : memref<18x32x4xf32, #tpu.memory_space<vmem>>, vector<16x2x4xf32>,
    %c1_18 = arith.constant 1 : index
    %c24 = arith.constant 24 : index
    %c0_19 = arith.constant 0 : index
    %19 = vector.load %arg15[%c1_18, %c24, %c0_19] : memref<18x32x4xf32, #tpu.memory_space<vmem>>, vector<16x2x4xf32>
    tpu.vector_store %arg15[%c1_18, %c24, %c0_19], %17 {strides = array<i32>} : memref<18x32x4xf32, #tpu.memory_space<vmem>>, vector<16x2x4xf32>,
    %20 = vector.shape_cast %13 : vector<256x4xf32> to vector<16x16x4xf32>
    %c1_20 = arith.constant 1 : index
    %c8 = arith.constant 8 : index
    %c0_21 = arith.constant 0 : index
    %21 = vector.load %arg15[%c1_20, %c8, %c0_21] : memref<18x32x4xf32, #tpu.memory_space<vmem>>, vector<16x16x4xf32>
    tpu.vector_store %arg15[%c1_20, %c8, %c0_21], %20 {strides = array<i32>} : memref<18x32x4xf32, #tpu.memory_space<vmem>>, vector<16x16x4xf32>,
    %c0_22 = arith.constant 0 : index
    %c7 = arith.constant 7 : index
    %c0_23 = arith.constant 0 : index
    %22 = tpu.strided_load %arg15[%c0_22, %c7, %c0_23] {strides = array<i32: 2, 2, 1>} : memref<18x32x4xf32, #tpu.memory_space<vmem>>, vector<8x8x4xf32>
    %23 = vector.shape_cast %22 : vector<8x8x4xf32> to vector<64x4xf32>
    %24 = arith.truncf %23 : vector<64x4xf32> to vector<64x4xbf16>
    %c0_24 = arith.constant 0 : index
    %c0_25 = arith.constant 0 : index
    %25 = vector.load %arg16[%c0_24, %c0_25] : memref<64x36xbf16, #tpu.memory_space<vmem>>, vector<64x4xbf16>
    tpu.vector_store %arg16[%c0_24, %c0_25], %24 {strides = array<i32>} : memref<64x36xbf16, #tpu.memory_space<vmem>>, vector<64x4xbf16>,
    %c0_26 = arith.constant 0 : index
    %c8_27 = arith.constant 8 : index
    %c0_28 = arith.constant 0 : index
    %26 = tpu.strided_load %arg15[%c0_26, %c8_27, %c0_28] {strides = array<i32: 2, 2, 1>} : memref<18x32x4xf32, #tpu.memory_space<vmem>>, vector<8x8x4xf32>
    %27 = vector.shape_cast %26 : vector<8x8x4xf32> to vector<64x4xf32>
    %28 = arith.truncf %27 : vector<64x4xf32> to vector<64x4xbf16>
    %c0_29 = arith.constant 0 : index
    %c4 = arith.constant 4 : index
    %29 = vector.load %arg16[%c0_29, %c4] : memref<64x36xbf16, #tpu.memory_space<vmem>>, vector<64x4xbf16>
    tpu.vector_store %arg16[%c0_29, %c4], %28 {strides = array<i32>} : memref<64x36xbf16, #tpu.memory_space<vmem>>, vector<64x4xbf16>,
    %c0_30 = arith.constant 0 : index
    %c9 = arith.constant 9 : index
    %c0_31 = arith.constant 0 : index
    %30 = tpu.strided_load %arg15[%c0_30, %c9, %c0_31] {strides = array<i32: 2, 2, 1>} : memref<18x32x4xf32, #tpu.memory_space<vmem>>, vector<8x8x4xf32>
    %31 = vector.shape_cast %30 : vector<8x8x4xf32> to vector<64x4xf32>
    %32 = arith.truncf %31 : vector<64x4xf32> to vector<64x4xbf16>
    %c0_32 = arith.constant 0 : index
    %c8_33 = arith.constant 8 : index
    %33 = vector.load %arg16[%c0_32, %c8_33] : memref<64x36xbf16, #tpu.memory_space<vmem>>, vector<64x4xbf16>
    tpu.vector_store %arg16[%c0_32, %c8_33], %32 {strides = array<i32>} : memref<64x36xbf16, #tpu.memory_space<vmem>>, vector<64x4xbf16>,
    %c1_34 = arith.constant 1 : index
    %c7_35 = arith.constant 7 : index
    %c0_36 = arith.constant 0 : index
    %34 = tpu.strided_load %arg15[%c1_34, %c7_35, %c0_36] {strides = array<i32: 2, 2, 1>} : memref<18x32x4xf32, #tpu.memory_space<vmem>>, vector<8x8x4xf32>
    %35 = vector.shape_cast %34 : vector<8x8x4xf32> to vector<64x4xf32>
    %36 = arith.truncf %35 : vector<64x4xf32> to vector<64x4xbf16>
    %c0_37 = arith.constant 0 : index
    %c12 = arith.constant 12 : index
    %37 = vector.load %arg16[%c0_37, %c12] : memref<64x36xbf16, #tpu.memory_space<vmem>>, vector<64x4xbf16>
    tpu.vector_store %arg16[%c0_37, %c12], %36 {strides = array<i32>} : memref<64x36xbf16, #tpu.memory_space<vmem>>, vector<64x4xbf16>,
    %c1_38 = arith.constant 1 : index
    %c8_39 = arith.constant 8 : index
    %c0_40 = arith.constant 0 : index
    %38 = tpu.strided_load %arg15[%c1_38, %c8_39, %c0_40] {strides = array<i32: 2, 2, 1>} : memref<18x32x4xf32, #tpu.memory_space<vmem>>, vector<8x8x4xf32>
    %39 = vector.shape_cast %38 : vector<8x8x4xf32> to vector<64x4xf32>
    %40 = arith.truncf %39 : vector<64x4xf32> to vector<64x4xbf16>
    %c0_41 = arith.constant 0 : index
    %c16 = arith.constant 16 : index
    %41 = vector.load %arg16[%c0_41, %c16] : memref<64x36xbf16, #tpu.memory_space<vmem>>, vector<64x4xbf16>
    tpu.vector_store %arg16[%c0_41, %c16], %40 {strides = array<i32>} : memref<64x36xbf16, #tpu.memory_space<vmem>>, vector<64x4xbf16>,
    %c1_42 = arith.constant 1 : index
    %c9_43 = arith.constant 9 : index
    %c0_44 = arith.constant 0 : index
    %42 = tpu.strided_load %arg15[%c1_42, %c9_43, %c0_44] {strides = array<i32: 2, 2, 1>} : memref<18x32x4xf32, #tpu.memory_space<vmem>>, vector<8x8x4xf32>
    %43 = vector.shape_cast %42 : vector<8x8x4xf32> to vector<64x4xf32>
    %44 = arith.truncf %43 : vector<64x4xf32> to vector<64x4xbf16>
    %c0_45 = arith.constant 0 : index
    %c20 = arith.constant 20 : index
    %45 = vector.load %arg16[%c0_45, %c20] : memref<64x36xbf16, #tpu.memory_space<vmem>>, vector<64x4xbf16>
    tpu.vector_store %arg16[%c0_45, %c20], %44 {strides = array<i32>} : memref<64x36xbf16, #tpu.memory_space<vmem>>, vector<64x4xbf16>,
    %c2 = arith.constant 2 : index
    %c7_46 = arith.constant 7 : index
    %c0_47 = arith.constant 0 : index
    %46 = tpu.strided_load %arg15[%c2, %c7_46, %c0_47] {strides = array<i32: 2, 2, 1>} : memref<18x32x4xf32, #tpu.memory_space<vmem>>, vector<8x8x4xf32>
    %47 = vector.shape_cast %46 : vector<8x8x4xf32> to vector<64x4xf32>
    %48 = arith.truncf %47 : vector<64x4xf32> to vector<64x4xbf16>
    %c0_48 = arith.constant 0 : index
    %c24_49 = arith.constant 24 : index
    %49 = vector.load %arg16[%c0_48, %c24_49] : memref<64x36xbf16, #tpu.memory_space<vmem>>, vector<64x4xbf16>
    tpu.vector_store %arg16[%c0_48, %c24_49], %48 {strides = array<i32>} : memref<64x36xbf16, #tpu.memory_space<vmem>>, vector<64x4xbf16>,
    %c2_50 = arith.constant 2 : index
    %c8_51 = arith.constant 8 : index
    %c0_52 = arith.constant 0 : index
    %50 = tpu.strided_load %arg15[%c2_50, %c8_51, %c0_52] {strides = array<i32: 2, 2, 1>} : memref<18x32x4xf32, #tpu.memory_space<vmem>>, vector<8x8x4xf32>
    %51 = vector.shape_cast %50 : vector<8x8x4xf32> to vector<64x4xf32>
    %52 = arith.truncf %51 : vector<64x4xf32> to vector<64x4xbf16>
    %c0_53 = arith.constant 0 : index
    %c28 = arith.constant 28 : index
    %53 = vector.load %arg16[%c0_53, %c28] : memref<64x36xbf16, #tpu.memory_space<vmem>>, vector<64x4xbf16>
    tpu.vector_store %arg16[%c0_53, %c28], %52 {strides = array<i32>} : memref<64x36xbf16, #tpu.memory_space<vmem>>, vector<64x4xbf16>,
    %c2_54 = arith.constant 2 : index
    %c9_55 = arith.constant 9 : index
    %c0_56 = arith.constant 0 : index
    %54 = tpu.strided_load %arg15[%c2_54, %c9_55, %c0_56] {strides = array<i32: 2, 2, 1>} : memref<18x32x4xf32, #tpu.memory_space<vmem>>, vector<8x8x4xf32>
    %55 = vector.shape_cast %54 : vector<8x8x4xf32> to vector<64x4xf32>
    %56 = arith.truncf %55 : vector<64x4xf32> to vector<64x4xbf16>
    %c0_57 = arith.constant 0 : index
    %c32 = arith.constant 32 : index
    %57 = vector.load %arg16[%c0_57, %c32] : memref<64x36xbf16, #tpu.memory_space<vmem>>, vector<64x4xbf16>
    tpu.vector_store %arg16[%c0_57, %c32], %56 {strides = array<i32>} : memref<64x36xbf16, #tpu.memory_space<vmem>>, vector<64x4xbf16>,
    %c0_58 = arith.constant 0 : index
    %c0_59 = arith.constant 0 : index
    %58 = vector.load %arg16[%c0_58, %c0_59] : memref<64x36xbf16, #tpu.memory_space<vmem>>, vector<64x36xbf16>
    %c0_60 = arith.constant 0 : index
    %c0_61 = arith.constant 0 : index
    %59 = vector.load %arg5[%c0_60, %c0_61] : memref<36x4xbf16, #tpu.memory_space<vmem>>, vector<36x4xbf16>
    %cst_62 = arith.constant dense<0.000000e+00> : vector<64x4xf32>
    %60 = tpu.matmul %58, %59, %cst_62 {dimension_numbers = #tpu.dot_dimension_numbers<[1], [0], [0], [1], [0, 0, 1, 1], [], []>} : vector<64x36xbf16>, vector<36x4xbf16>, vector<64x4xf32> -> vector<64x4xf32>
    %c0_63 = arith.constant 0 : index
    %c0_64 = arith.constant 0 : index
    %61 = vector.load %arg6[%c0_63, %c0_64] : memref<1x4xf32, #tpu.memory_space<vmem>>, vector<1x4xf32>
    %62 = vector.broadcast %61 : vector<1x4xf32> to vector<64x4xf32>
    %63 = arith.mulf %60, %62 : vector<64x4xf32>
    %c0_65 = arith.constant 0 : index
    %c0_66 = arith.constant 0 : index
    %64 = vector.load %arg7[%c0_65, %c0_66] : memref<1x4xf32, #tpu.memory_space<vmem>>, vector<1x4xf32>
    %65 = vector.broadcast %64 : vector<1x4xf32> to vector<64x4xf32>
    %66 = arith.addf %63, %65 : vector<64x4xf32>
    %cst_67 = arith.constant 0.000000e+00 : f32
    %67 = vector.broadcast %cst_67 : f32 to vector<64x4xf32>
    %68 = arith.maximumf %66, %67 : vector<64x4xf32>
    %69 = arith.truncf %68 : vector<64x4xf32> to vector<64x4xbf16>
    %c0_68 = arith.constant 0 : index
    %c0_69 = arith.constant 0 : index
    %70 = vector.load %arg8[%c0_68, %c0_69] : memref<4x16xbf16, #tpu.memory_space<vmem>>, vector<4x16xbf16>
    %cst_70 = arith.constant dense<0.000000e+00> : vector<64x16xf32>
    %71 = tpu.matmul %69, %70, %cst_70 {dimension_numbers = #tpu.dot_dimension_numbers<[1], [0], [0], [1], [0, 0, 1, 1], [], []>} : vector<64x4xbf16>, vector<4x16xbf16>, vector<64x16xf32> -> vector<64x16xf32>
    %c0_71 = arith.constant 0 : index
    %c0_72 = arith.constant 0 : index
    %72 = vector.load %arg9[%c0_71, %c0_72] : memref<1x16xf32, #tpu.memory_space<vmem>>, vector<1x16xf32>
    %73 = vector.broadcast %72 : vector<1x16xf32> to vector<64x16xf32>
    %74 = arith.mulf %71, %73 : vector<64x16xf32>
    %c0_73 = arith.constant 0 : index
    %c0_74 = arith.constant 0 : index
    %75 = vector.load %arg10[%c0_73, %c0_74] : memref<1x16xf32, #tpu.memory_space<vmem>>, vector<1x16xf32>
    %76 = vector.broadcast %75 : vector<1x16xf32> to vector<64x16xf32>
    %77 = arith.addf %74, %76 : vector<64x16xf32>
    %c0_75 = arith.constant 0 : index
    %c0_76 = arith.constant 0 : index
    %c0_77 = arith.constant 0 : index
    %c0_78 = arith.constant 0 : index
    %78 = tpu.strided_load %arg1[%c0_75, %c0_76, %c0_77, %c0_78] {strides = array<i32: 1, 2, 2, 1>} : memref<1x16x16x4xf32, #tpu.memory_space<vmem>>, vector<1x8x8x4xf32>
    %79 = vector.shape_cast %78 : vector<1x8x8x4xf32> to vector<8x8x4xf32>
    %80 = vector.shape_cast %79 : vector<8x8x4xf32> to vector<64x4xf32>
    %81 = arith.truncf %80 : vector<64x4xf32> to vector<64x4xbf16>
    %c0_79 = arith.constant 0 : index
    %c0_80 = arith.constant 0 : index
    %82 = vector.load %arg11[%c0_79, %c0_80] : memref<4x16xbf16, #tpu.memory_space<vmem>>, vector<4x16xbf16>
    %cst_81 = arith.constant dense<0.000000e+00> : vector<64x16xf32>
    %83 = tpu.matmul %81, %82, %cst_81 {dimension_numbers = #tpu.dot_dimension_numbers<[1], [0], [0], [1], [0, 0, 1, 1], [], []>} : vector<64x4xbf16>, vector<4x16xbf16>, vector<64x16xf32> -> vector<64x16xf32>
    %c0_82 = arith.constant 0 : index
    %c0_83 = arith.constant 0 : index
    %84 = vector.load %arg12[%c0_82, %c0_83] : memref<1x16xf32, #tpu.memory_space<vmem>>, vector<1x16xf32>
    %85 = vector.broadcast %84 : vector<1x16xf32> to vector<64x16xf32>
    %86 = arith.mulf %83, %85 : vector<64x16xf32>
    %c0_84 = arith.constant 0 : index
    %c0_85 = arith.constant 0 : index
    %87 = vector.load %arg13[%c0_84, %c0_85] : memref<1x16xf32, #tpu.memory_space<vmem>>, vector<1x16xf32>
    %88 = vector.broadcast %87 : vector<1x16xf32> to vector<64x16xf32>
    %89 = arith.addf %86, %88 : vector<64x16xf32>
    %90 = arith.addf %77, %89 : vector<64x16xf32>
    %cst_86 = arith.constant 0.000000e+00 : f32
    %91 = vector.broadcast %cst_86 : f32 to vector<64x16xf32>
    %92 = arith.maximumf %90, %91 : vector<64x16xf32>
    %93 = arith.truncf %92 : vector<64x16xf32> to vector<64x16xbf16>
    %c0_87 = arith.constant 0 : index
    %c0_88 = arith.constant 0 : index
    %c0_89 = arith.constant 0 : index
    %94 = vector.load %arg14[%c0_87, %c0_88, %c0_89] : memref<1x64x16xbf16, #tpu.memory_space<vmem>>, vector<1x64x16xbf16>
    %95 = vector.shape_cast %94 : vector<1x64x16xbf16> to vector<64x16xbf16>
    %96 = vector.shape_cast %93 : vector<64x16xbf16> to vector<1x64x16xbf16>
    tpu.vector_store %arg14[%c0_87, %c0_88, %c0_89], %96 {strides = array<i32>} : memref<1x64x16xbf16, #tpu.memory_space<vmem>>, vector<1x64x16xbf16>,
    return
  }
  func.func @transform_0(%arg0: i32) -> (i32, i32, i32, i32) {
    %c0_i32 = arith.constant 0 : i32
    %c0_i32_0 = arith.constant 0 : i32
    %c0_i32_1 = arith.constant 0 : i32
    %c0_i32_2 = arith.constant 0 : i32
    return %arg0, %c0_i32, %c0_i32_0, %c0_i32_1 : i32, i32, i32, i32
  }
  func.func @transform_1(%arg0: i32) -> (i32, i32) {
    %c0_i32 = arith.constant 0 : i32
    %c0_i32_0 = arith.constant 0 : i32
    %c0_i32_1 = arith.constant 0 : i32
    return %c0_i32, %c0_i32_0 : i32, i32
  }
  func.func @transform_2(%arg0: i32) -> (i32, i32) {
    %c0_i32 = arith.constant 0 : i32
    %c0_i32_0 = arith.constant 0 : i32
    %c0_i32_1 = arith.constant 0 : i32
    return %c0_i32, %c0_i32_0 : i32, i32
  }
  func.func @transform_3(%arg0: i32) -> (i32, i32) {
    %c0_i32 = arith.constant 0 : i32
    %c0_i32_0 = arith.constant 0 : i32
    %c0_i32_1 = arith.constant 0 : i32
    return %c0_i32, %c0_i32_0 : i32, i32
  }
  func.func @transform_4(%arg0: i32) -> (i32, i32) {
    %c0_i32 = arith.constant 0 : i32
    %c0_i32_0 = arith.constant 0 : i32
    %c0_i32_1 = arith.constant 0 : i32
    return %c0_i32, %c0_i32_0 : i32, i32
  }
  func.func @transform_5(%arg0: i32) -> (i32, i32) {
    %c0_i32 = arith.constant 0 : i32
    %c0_i32_0 = arith.constant 0 : i32
    %c0_i32_1 = arith.constant 0 : i32
    return %c0_i32, %c0_i32_0 : i32, i32
  }
  func.func @transform_6(%arg0: i32) -> (i32, i32) {
    %c0_i32 = arith.constant 0 : i32
    %c0_i32_0 = arith.constant 0 : i32
    %c0_i32_1 = arith.constant 0 : i32
    return %c0_i32, %c0_i32_0 : i32, i32
  }
  func.func @transform_7(%arg0: i32) -> (i32, i32) {
    %c0_i32 = arith.constant 0 : i32
    %c0_i32_0 = arith.constant 0 : i32
    %c0_i32_1 = arith.constant 0 : i32
    return %c0_i32, %c0_i32_0 : i32, i32
  }
  func.func @transform_8(%arg0: i32) -> (i32, i32) {
    %c0_i32 = arith.constant 0 : i32
    %c0_i32_0 = arith.constant 0 : i32
    %c0_i32_1 = arith.constant 0 : i32
    return %c0_i32, %c0_i32_0 : i32, i32
  }
  func.func @transform_9(%arg0: i32) -> (i32, i32) {
    %c0_i32 = arith.constant 0 : i32
    %c0_i32_0 = arith.constant 0 : i32
    %c0_i32_1 = arith.constant 0 : i32
    return %c0_i32, %c0_i32_0 : i32, i32
  }
  func.func @transform_10(%arg0: i32) -> (i32, i32) {
    %c0_i32 = arith.constant 0 : i32
    %c0_i32_0 = arith.constant 0 : i32
    %c0_i32_1 = arith.constant 0 : i32
    return %c0_i32, %c0_i32_0 : i32, i32
  }
  func.func @transform_11(%arg0: i32) -> (i32, i32) {
    %c0_i32 = arith.constant 0 : i32
    %c0_i32_0 = arith.constant 0 : i32
    %c0_i32_1 = arith.constant 0 : i32
    return %c0_i32, %c0_i32_0 : i32, i32
  }
  func.func @transform_12(%arg0: i32) -> (i32, i32) {
    %c0_i32 = arith.constant 0 : i32
    %c0_i32_0 = arith.constant 0 : i32
    %c0_i32_1 = arith.constant 0 : i32
    return %c0_i32, %c0_i32_0 : i32, i32
  }
  func.func @transform_13(%arg0: i32) -> (i32, i32, i32) {
    %c0_i32 = arith.constant 0 : i32
    %c0_i32_0 = arith.constant 0 : i32
    %c0_i32_1 = arith.constant 0 : i32
    return %arg0, %c0_i32, %c0_i32_0 : i32, i32, i32
  }
}

</mosaic_0001>

<bundles_post_ra>
// kernel: tpu_custom_call.1
= control target key start
LH: loop header
LB: loop body
LE: loop exit
PB: predicated region body
PF: predicated region fallthrough
CT: control target
= control target key end

     0   :  { %s2079_s25 = smov 0   ;;  %s2425_s0 = inlined_call_operand.vmem [shape: f32[2,16,16,4], index: 0, kind: input, shape index: {}]   ;;  %s2426_s1 = inlined_call_operand.vmem [shape: bf16[4,4], index: 1, kind: input, shape index: {}]   ;;  %s2427_s2 = inlined_call_operand.vmem [shape: f32[1,4], index: 2, kind: input, shape index: {}]   ;;  %s2428_s3 = inlined_call_operand.vmem [shape: f32[1,4], index: 3, kind: input, shape index: {}]   ;;  %s2429_s4 = inlined_call_operand.vmem [shape: bf16[36,4], index: 4, kind: input, shape index: {}]   ;;  %s2430_s5 = inlined_call_operand.vmem [shape: f32[1,4], index: 5, kind: input, shape index: {}]   ;;  %s2431_s6 = inlined_call_operand.vmem [shape: f32[1,4], index: 6, kind: input, shape index: {}]   ;;  %s2432_s7 = inlined_call_operand.vmem [shape: bf16[4,16], index: 7, kind: input, shape index: {}]   ;;  %s2433_s8 = inlined_call_operand.vmem [shape: f32[1,16], index: 8, kind: input, shape index: {}]   ;;  %s2434_s9 = inlined_call_operand.vmem [shape: f32[1,16], index: 9, kind: input, shape index: {}]   ;;  %s2435_s10 = inlined_call_operand.vmem [shape: bf16[4,16], index: 10, kind: input, shape index: {}]   ;;  %s2436_s11 = inlined_call_operand.vmem [shape: f32[1,16], index: 11, kind: input, shape index: {}]   ;;  %s2437_s12 = inlined_call_operand.vmem [shape: f32[1,16], index: 12, kind: input, shape index: {}]   ;;  %s2438_s13 = inlined_call_operand.vmem [shape: bf16[2,64,16], index: 13, kind: output, shape index: {}]  }
   0x1 LB: > { %s1791_s26 = sadd.s32 4294967295, %s1998_s25   ;;  %p1795_p0 = scmp.ge.s32.totalorder %s1998_s25, 1  ;;  %s1998_s25 = sphi %s2079_s25, %s23_s25  }
   0x2   : > { %p387_p1 = scmp.lt.s32.totalorder %s1998_s25, 3 }
   0x4   : > { %p388_p2 = pnand %p1795_p0, %p387_p1 }
   0x5   : > { %v490_v0 = vld [vmem:[%s2426_s1] sm:$0x3] (!%p388_p2)  ;;  %vm540_vm0 = vcmask (!%p388_p2), 1041408   ;;  %p431_p3 = scmp.lt.s32.totalorder (!%p388_p2), %s1791_s26, 1  ;;  %vm491_vm1 = vcmask (!%p388_p2), 31744   ;;  %vm825_vm2 = vcmask (!%p388_p2), 25600  }
   0x6   : > { %391 = sbr.rel (%p388_p2) target bundleno = 915 (0x393), region = 72  ;;  %1968 = vmatprep.subr.msk.bf16.mxu0 (!%p388_p2), %vm540_vm0, %v490_v0  ;;  %v542_v1 = vsel (!%p388_p2), %vm540_vm0, %v490_v0, 0  ;;  %v2000_v50 = vmov (!%p388_p2), 0.0   ;;  %v2170_v51 = vld [vmem:[%s2427_s2] ss:$0 sm:$0xff] (!%p388_p2)  ;;  %s2001_s20 = smov (!%p388_p2), 8  }
   0x7   : > { %1901 = vmatpush3.bf16.msra.mxu0 (!%p388_p2), %v542_v1  ;;  %816 = vst.msk [vmem:[#allocation2 + $0x8] sm:$0xff] (!%p388_p2), %vm491_vm1, %v2000_v50  ;;  %817 = vst.msk [vmem:[#allocation2 + $0x10] sm:$0xff] (!%p388_p2), %vm491_vm1, %v2000_v50  ;;  %v2175_v53 = vld [vmem:[%s2428_s3] ss:$0 sm:$0xff] (!%p388_p2)  ;;  %s2002_s21 = smov (!%p388_p2), 4   ;;  %s2003_s22 = smov (!%p388_p2), 24  }
   0x8   : > { %815 = vst.msk [vmem:[#allocation2] sm:$0xff] (!%p388_p2), %vm491_vm1, %v2000_v50  ;;  %s2004_s23 = smov (!%p388_p2), 28   ;;  %s2005_s24 = smov (!%p388_p2), 32   ;;  %vm950_vm3 = vcmask (!%p388_p2), 64544   ;;  %vm991_vm4 = vcmask (!%p388_p2), 97344   ;;  %vm1032_vm5 = vcmask (!%p388_p2), 130144  }
   0x9   : > { %827 = vst.msk [vmem:[#allocation2 + $0x46] sm:$0x3] (!%p388_p2), %vm825_vm2, %v2000_v50  ;;  %829 = vst.msk [vmem:[#allocation2 + $0x86] sm:$0x3] (!%p388_p2), %vm825_vm2, %v2000_v50  ;;  %s2006_s27 = smov (!%p388_p2), 12   ;;  %s2007_s30 = smov (!%p388_p2), 16  }
   0xa   : > { %826 = vst.msk [vmem:[#allocation2 + $0x26] sm:$0x3] (!%p388_p2), %vm825_vm2, %v2000_v50  ;;  %828 = vst.msk [vmem:[#allocation2 + $0x66] sm:$0x3] (!%p388_p2), %vm825_vm2, %v2000_v50  ;;  %s2008_s14 = smov (!%p388_p2), 20   ;;  %vm1073_vm6 = vcmask (!%p388_p2), 162944  }
   0xb   : > { %830 = vst.msk [vmem:[#allocation2 + $0xa6] sm:$0x3] (!%p388_p2), %vm825_vm2, %v2000_v50  ;;  %831 = vst.msk [vmem:[#allocation2 + $0xc6] sm:$0x3] (!%p388_p2), %vm825_vm2, %v2000_v50  ;;  %vm1114_vm7 = vcmask (!%p388_p2), 195744   ;;  %vm1156_vm8 = vcmask (!%p388_p2), 228544  }
   0xc   : > { %832 = vst.msk [vmem:[#allocation2 + $0xe6] sm:$0x3] (!%p388_p2), %vm825_vm2, %v2000_v50  ;;  %833 = vst.msk [vmem:[#allocation2 + $0x106] sm:$0x3] (!%p388_p2), %vm825_vm2, %v2000_v50  ;;  %vm1197_vm9 = vcmask (!%p388_p2), 261344   ;;  %vm1238_vm10 = vcmask (!%p388_p2), 294144  }
   0xd   : > { %s2440_s26 = smov (!%p431_p3, %s1791_s26), 1  ;;  %834 = vst.msk [vmem:[#allocation2 + $0x126] sm:$0x3] %vm825_vm2, %v2000_v50  ;;  %835 = vst.msk [vmem:[#allocation2 + $0x146] sm:$0x3] %vm825_vm2, %v2000_v50  ;;  %vm1267_vm11 = vcmask 293888  }
   0xe   : > { %s1856_s29 = sshll.u32 %s2440_s26, 8  ;;  %836 = vst.msk [vmem:[#allocation2 + $0x166] sm:$0x3] %vm825_vm2, %v2000_v50  ;;  %837 = vst.msk [vmem:[#allocation2 + $0x186] sm:$0x3] %vm825_vm2, %v2000_v50  ;;  %vm1679_vm12 = vcmask 125952  }
   0xf   : > { %s2098_s15 = scalar_lea.vmem %s2425_s0, %s1856_s29  ;;  %838 = vst.msk [vmem:[#allocation2 + $0x1a6] sm:$0x3] %vm825_vm2, %v2000_v50  ;;  %839 = vst.msk [vmem:[#allocation2 + $0x1c6] sm:$0x3] %vm825_vm2, %v2000_v50 }
  0x10   : > { %v442_v2 = vld [vmem:[%s2098_s15] sm:$0xff]  ;;  %v443_v3 = vld [vmem:[%s2098_s15 + $0x8] sm:$0xff]  ;;  %v444_v4 = vld [vmem:[%s2098_s15 + $0x10] sm:$0xff]  ;;  %840 = vst.msk [vmem:[#allocation2 + $0x1e6] sm:$0x3] %vm825_vm2, %v2000_v50 }
  0x11   : > { %v474_v5 = vpack.c.bf16 %v443_v3, %v442_v2  ;;  %v445_v6 = vld [vmem:[%s2098_s15 + $0x18] sm:$0xff]  ;;  %v446_v7 = vld [vmem:[%s2098_s15 + $0x20] sm:$0xff]  ;;  %v447_v8 = vld [vmem:[%s2098_s15 + $0x28] sm:$0xff]  ;;  %841 = vst.msk [vmem:[#allocation2 + $0x206] sm:$0x3] %vm825_vm2, %v2000_v50 }
  0x12   : > { %v475_v9 = vpack.c.bf16 %v445_v6, %v444_v4  ;;  %v476_v10 = vpack.c.bf16 %v447_v8, %v446_v7  ;;  %v448_v11 = vld [vmem:[%s2098_s15 + $0x30] sm:$0xff]  ;;  %v449_v12 = vld [vmem:[%s2098_s15 + $0x38] sm:$0xff]  ;;  %v450_v13 = vld [vmem:[%s2098_s15 + $0x40] sm:$0xff] }
  0x13   : > { %1902 = vmatprep.mubr.msk.bf16.mxu0 %vm491_vm1, %v474_v5  ;;  %v451_v14 = vld [vmem:[%s2098_s15 + $0x48] sm:$0xff]  ;;  %v477_v15 = vpack.c.bf16 %v449_v12, %v448_v11  ;;  %v452_v17 = vld [vmem:[%s2098_s15 + $0x50] sm:$0xff]  ;;  %v453_v18 = vld [vmem:[%s2098_s15 + $0x58] sm:$0xff] }
  0x14   : > { %1903 = vmatmul.mubr.msk.bf16.vlgmr.msra.gmra.mrb[0].mxu0 %vm491_vm1, %v475_v9  ;;  %v478_v16 = vpack.c.bf16 %v451_v14, %v450_v13  ;;  %v454_v19 = vld [vmem:[%s2098_s15 + $0x60] sm:$0xff]  ;;  %v455_v20 = vld [vmem:[%s2098_s15 + $0x68] sm:$0xff]  ;;  %v479_v21 = vpack.c.bf16 %v453_v18, %v452_v17  ;;  %v456_v23 = vld [vmem:[%s2098_s15 + $0x70] sm:$0xff] }
  0x15   : > { %1906 = vmatprep.mubr.msk.bf16.mxu0 %vm491_vm1, %v476_v10  ;;  %v480_v22 = vpack.c.bf16 %v455_v20, %v454_v19  ;;  %v457_v24 = vld [vmem:[%s2098_s15 + $0x78] sm:$0xff]  ;;  %v458_v25 = vld [vmem:[%s2098_s15 + $0x80] sm:$0xff]  ;;  %v459_v26 = vld [vmem:[%s2098_s15 + $0x88] sm:$0xff] }
  0x16   : > { %v481_v27 = vpack.c.bf16 %v457_v24, %v456_v23  ;;  %v482_v28 = vpack.c.bf16 %v459_v26, %v458_v25  ;;  %v460_v29 = vld [vmem:[%s2098_s15 + $0x90] sm:$0xff]  ;;  %v461_v30 = vld [vmem:[%s2098_s15 + $0x98] sm:$0xff]  ;;  %v462_v31 = vld [vmem:[%s2098_s15 + $0xa0] sm:$0xff] }
  0x17   : > { %v463_v32 = vld [vmem:[%s2098_s15 + $0xa8] sm:$0xff]  ;;  %v483_v33 = vpack.c.bf16 %v461_v30, %v460_v29  ;;  %v464_v35 = vld [vmem:[%s2098_s15 + $0xb0] sm:$0xff]  ;;  %v465_v36 = vld [vmem:[%s2098_s15 + $0xb8] sm:$0xff] }
  0x18   : > { %v484_v34 = vpack.c.bf16 %v463_v32, %v462_v31  ;;  %v466_v37 = vld [vmem:[%s2098_s15 + $0xc0] sm:$0xff]  ;;  %v467_v38 = vld [vmem:[%s2098_s15 + $0xc8] sm:$0xff]  ;;  %v485_v39 = vpack.c.bf16 %v465_v36, %v464_v35  ;;  %v468_v41 = vld [vmem:[%s2098_s15 + $0xd0] sm:$0xff] }
  0x19   : > { %v486_v40 = vpack.c.bf16 %v467_v38, %v466_v37  ;;  %v469_v42 = vld [vmem:[%s2098_s15 + $0xd8] sm:$0xff]  ;;  %v470_v43 = vld [vmem:[%s2098_s15 + $0xe0] sm:$0xff]  ;;  %v471_v44 = vld [vmem:[%s2098_s15 + $0xe8] sm:$0xff] }
  0x1a   : > { %v487_v45 = vpack.c.bf16 %v469_v42, %v468_v41  ;;  %v488_v46 = vpack.c.bf16 %v471_v44, %v470_v43  ;;  %v472_v47 = vld [vmem:[%s2098_s15 + $0xf0] sm:$0xff]  ;;  %v473_v48 = vld [vmem:[%s2098_s15 + $0xf8] sm:$0xff] }
  0x1b   : > { %v489_v49 = vpack.c.bf16 %v473_v48, %v472_v47  ;;  %v956_v19 = vld [vmem:[#allocation2 + $0x9] ss:$2 sm:$0xff]  ;;  %v915_v20 = vld [vmem:[#allocation2 + $0x8] ss:$2 sm:$0xff] }
  0x1c   : > { %1907 = vmatmul.mubr.msk.bf16.gmra.mrb[4].mxu0 %vm491_vm1, %v477_v15  ;;  %v891_v32 = vld [vmem:[#allocation2 + $0x7] ss:$2 sm:$0xff] }
  0x1d   : > { %1910 = vmatprep.mubr.msk.bf16.mxu0 %vm491_vm1, %v478_v16 }
  0x24   : > { %1911 = vmatmul.mubr.msk.bf16.gmra.mrb[8].mxu0 %vm491_vm1, %v479_v21 }
  0x25   : > { %1914 = vmatprep.mubr.msk.bf16.mxu0 %vm491_vm1, %v480_v22 }
  0x2c   : > { %1915 = vmatmul.mubr.msk.bf16.gmra.mrb[12].mxu0 %vm491_vm1, %v481_v27 }
  0x2d   : > { %1918 = vmatprep.mubr.msk.bf16.mxu0 %vm491_vm1, %v482_v28 }
  0x34   : > { %1919 = vmatmul.mubr.msk.bf16.gmra.mrb[16].mxu0 %vm491_vm1, %v483_v33 }
  0x35   : > { %1922 = vmatprep.mubr.msk.bf16.mxu0 %vm491_vm1, %v484_v34 }
  0x3c   : > { %1923 = vmatmul.mubr.msk.bf16.gmra.mrb[20].mxu0 %vm491_vm1, %v485_v39 }
  0x3d   : > { %1926 = vmatprep.mubr.msk.bf16.mxu0 %vm491_vm1, %v486_v40 }
  0x44   : > { %1927 = vmatmul.mubr.msk.bf16.gmra.mrb[24].mxu0 %vm491_vm1, %v487_v45 }
  0x45   : > { %1930 = vmatprep.mubr.msk.bf16.mxu0 %vm491_vm1, %v488_v46 }
  0x4c   : > { %1931 = vmatmul.mubr.msk.bf16.gmra.mrb[28].mxu0 %vm491_vm1, %v489_v49 }
  0xe7   : > { %v1904_v52 = vpop.f32.mrb[0].mxu0 }
  0xe8   : > { %v714_v54 = vmul.f32 %v1904_v52, %v2170_v51  ;;  %v578_v55 = vpop.f32.mrb[1].mxu0 }
  0xe9   : > { %v712_v56 = vmul.f32 %v2170_v51, %v578_v55  ;;  %v1905_v57 = vpop.f32.mrb[2].mxu0 }
  0xea   : > { %v753_v58 = vadd.f32 %v2175_v53, %v714_v54  ;;  %v715_v59 = vmul.f32 %v1905_v57, %v2170_v51  ;;  %v581_v60 = vpop.f32.mrb[3].mxu0 }
  0xeb   : > { %v751_v61 = vadd.f32 %v2175_v53, %v712_v56  ;;  %v713_v62 = vmul.f32 %v2170_v51, %v581_v60 }
  0xec   : > { %v785_v63 = vmax.f32 %v753_v58, 0.0  ;;  %v754_v0 = vadd.f32 %v2175_v53, %v715_v59 }
  0xed   : > { %v783_v1 = vmax.f32 %v751_v61, 0.0  ;;  %v752_v2 = vadd.f32 %v2175_v53, %v713_v62 }
  0xee   : > { %860 = vst.msk [vmem:[#allocation2 + $0x48] sm:$0xff] %vm491_vm1, %v785_v63  ;;  %v786_v3 = vmax.f32 %v754_v0, 0.0 }
  0xef   : > { %858 = vst.msk [vmem:[#allocation2 + $0x28] sm:$0xff] %vm491_vm1, %v783_v1  ;;  %v784_v4 = vmax.f32 %v752_v2, 0.0  ;;  %v1908_v5 = vpop.f32.mrb[4].mxu0 }
  0xf0   : > { %861 = vst.msk [vmem:[#allocation2 + $0x50] sm:$0xff] %vm491_vm1, %v786_v3  ;;  %v718_v6 = vmul.f32 %v1908_v5, %v2170_v51  ;;  %v594_v7 = vpop.f32.mrb[5].mxu0 }
  0xf1   : > { %859 = vst.msk [vmem:[#allocation2 + $0x30] sm:$0xff] %vm491_vm1, %v784_v4  ;;  %v716_v8 = vmul.f32 %v2170_v51, %v594_v7  ;;  %v1909_v9 = vpop.f32.mrb[6].mxu0 }
  0xf2   : > { %v757_v10 = vadd.f32 %v2175_v53, %v718_v6  ;;  %v719_v11 = vmul.f32 %v1909_v9, %v2170_v51  ;;  %v597_v12 = vpop.f32.mrb[7].mxu0 }
  0xf3   : > { %v755_v13 = vadd.f32 %v2175_v53, %v716_v8  ;;  %v717_v14 = vmul.f32 %v2170_v51, %v597_v12 }
  0xf4   : > { %v789_v15 = vmax.f32 %v757_v10, 0.0  ;;  %v758_v16 = vadd.f32 %v2175_v53, %v719_v11 }
  0xf5   : > { %v787_v17 = vmax.f32 %v755_v13, 0.0  ;;  %v756_v18 = vadd.f32 %v2175_v53, %v717_v14 }
  0xf6   : > { %864 = vst.msk [vmem:[#allocation2 + $0x88] sm:$0xff] %vm491_vm1, %v789_v15  ;;  %v790_v21 = vmax.f32 %v758_v16, 0.0 }
  0xf7   : > { %862 = vst.msk [vmem:[#allocation2 + $0x68] sm:$0xff] %vm491_vm1, %v787_v17  ;;  %v788_v22 = vmax.f32 %v756_v18, 0.0  ;;  %v1912_v23 = vpop.f32.mrb[8].mxu0  ;;  %v958_v24 = vld [vmem:[#allocation2 + $0x49] ss:$2 sm:$0xff] }
  0xf8   : > { %v917_v25 = vld [vmem:[#allocation2 + $0x48] ss:$2 sm:$0xff]  ;;  %865 = vst.msk [vmem:[#allocation2 + $0x90] sm:$0xff] %vm491_vm1, %v790_v21  ;;  %v722_v26 = vmul.f32 %v1912_v23, %v2170_v51  ;;  %v610_v27 = vpop.f32.mrb[9].mxu0  ;;  %v971_v28 = vpack.c.bf16 %v958_v24, %v956_v19  ;;  %v893_v38 = vld [vmem:[#allocation2 + $0x47] ss:$2 sm:$0xff] }
  0xf9   : > { %v930_v29 = vpack.c.bf16 %v917_v25, %v915_v20  ;;  %863 = vst.msk [vmem:[#allocation2 + $0x70] sm:$0xff] %vm491_vm1, %v788_v22  ;;  %v720_v30 = vmul.f32 %v2170_v51, %v610_v27  ;;  %v1913_v31 = vpop.f32.mrb[10].mxu0  ;;  %v906_v41 = vpack.c.bf16 %v893_v38, %v891_v32  ;;  %v1121_v47 = vld [vmem:[#allocation2 + $0x47] ss:$2 sm:$0xff]  ;;  %v1162_v62 = vld [vmem:[#allocation2 + $0x48] ss:$2 sm:$0xff] }
  0xfa   : > { %v761_v33 = vadd.f32 %v2175_v53, %v722_v26  ;;  %v723_v34 = vmul.f32 %v1913_v31, %v2170_v51  ;;  %979 = vrot.lane.b32.xlu1 %v971_v28, %s2001_s20  ;;  %v613_v35 = vpop.f32.mrb[11].mxu0  ;;  %v1203_v6 = vld [vmem:[#allocation2 + $0x49] ss:$2 sm:$0xff] }
  0xfb   : > { %938 = vrot.lane.b32.xlu0 %v930_v29, %s2002_s21  ;;  %v759_v36 = vadd.f32 %v2175_v53, %v720_v30  ;;  %v721_v37 = vmul.f32 %v2170_v51, %v613_v35  ;;  %910 = vst.msk [vmem:[#allocation3] sm:$0xff] %vm491_vm1, %v906_v41  ;;  %v997_v23 = vld [vmem:[#allocation2 + $0x27] ss:$2 sm:$0xff] }
  0xfc   : > { %v793_v39 = vmax.f32 %v761_v33, 0.0  ;;  %v762_v40 = vadd.f32 %v2175_v53, %v723_v34  ;;  %v1038_v34 = vld [vmem:[#allocation2 + $0x28] ss:$2 sm:$0xff] }
  0xfd   : > { %v791_v42 = vmax.f32 %v759_v36, 0.0  ;;  %v760_v43 = vadd.f32 %v2175_v53, %v721_v37 }
  0xfe   : > { %868 = vst.msk [vmem:[#allocation2 + $0xc8] sm:$0xff] %vm491_vm1, %v793_v39  ;;  %v794_v44 = vmax.f32 %v762_v40, 0.0 }
  0xff   : > { %866 = vst.msk [vmem:[#allocation2 + $0xa8] sm:$0xff] %vm491_vm1, %v791_v42  ;;  %v792_v45 = vmax.f32 %v760_v43, 0.0  ;;  %v1916_v46 = vpop.f32.mrb[12].mxu0  ;;  %v1123_v48 = vld [vmem:[#allocation2 + $0x87] ss:$2 sm:$0xff] }
 0x100   : > { %869 = vst.msk [vmem:[#allocation2 + $0xd0] sm:$0xff] %vm491_vm1, %v794_v44  ;;  %v726_v49 = vmul.f32 %v1916_v46, %v2170_v51  ;;  %v626_v50 = vpop.f32.mrb[13].mxu0  ;;  %v1136_v52 = vpack.c.bf16 %v1123_v48, %v1121_v47  ;;  %v1164_v56 = vld [vmem:[#allocation2 + $0x88] ss:$2 sm:$0xff]  ;;  %v1205_v4 = vld [vmem:[#allocation2 + $0x89] ss:$2 sm:$0xff] }
 0x101   : > { %867 = vst.msk [vmem:[#allocation2 + $0xb0] sm:$0xff] %vm491_vm1, %v792_v45  ;;  %v724_v54 = vmul.f32 %v2170_v51, %v626_v50  ;;  %v1917_v55 = vpop.f32.mrb[14].mxu0  ;;  %v1177_v1 = vpack.c.bf16 %v1164_v56, %v1162_v62  ;;  %v960_v9 = vld [vmem:[#allocation2 + $0x89] ss:$2 sm:$0xff]  ;;  %v1218_v13 = vpack.c.bf16 %v1205_v4, %v1203_v6  ;;  %v1040_v32 = vld [vmem:[#allocation2 + $0x68] ss:$2 sm:$0xff] }
 0x102   : > { %v765_v57 = vadd.f32 %v2175_v53, %v726_v49  ;;  %v727_v58 = vmul.f32 %v1917_v55, %v2170_v51  ;;  %1144 = vrot.lane.b32.xlu0 %v1136_v52, %s2003_s22  ;;  %v629_v59 = vpop.f32.mrb[15].mxu0  ;;  %v999_v17 = vld [vmem:[#allocation2 + $0x67] ss:$2 sm:$0xff]  ;;  %v1053_v41 = vpack.c.bf16 %v1040_v32, %v1038_v34  ;;  %v919_v4 = vld [vmem:[#allocation2 + $0x88] ss:$2 sm:$0xff] }
 0x103   : > { %v763_v60 = vadd.f32 %v2175_v53, %v724_v54  ;;  %v725_v61 = vmul.f32 %v2170_v51, %v629_v59  ;;  %v895_v24 = vld [vmem:[#allocation2 + $0x87] ss:$2 sm:$0xff]  ;;  %v1012_v28 = vpack.c.bf16 %v999_v17, %v997_v23 }
 0x104   : > { %v797_v63 = vmax.f32 %v765_v57, 0.0  ;;  %v766_v0 = vadd.f32 %v2175_v53, %v727_v58  ;;  %v1081_v45 = vld [vmem:[#allocation2 + $0x69] ss:$2 sm:$0xff]  ;;  %v1989_v47 = vld [vmem:[%s2429_s4] sm:$0xff]  }
 0x105   : > { %v795_v2 = vmax.f32 %v763_v60, 0.0  ;;  %v764_v3 = vadd.f32 %v2175_v53, %v725_v61  ;;  %v1079_v55 = vld [vmem:[#allocation2 + $0x29] ss:$2 sm:$0xff]  ;;  %1934 = vmatprep.subr.bf16.mxu1 %v1989_v47 }
 0x106   : > { %872 = vst.msk [vmem:[#allocation2 + $0x108] sm:$0xff] %vm491_vm1, %v797_v63  ;;  %v798_v5 = vmax.f32 %v766_v0, 0.0  ;;  %1185 = vrot.lane.b32.xlu0 %v1177_v1, %s2004_s23  ;;  %v1094_v59 = vpack.c.bf16 %v1081_v45, %v1079_v55  ;;  %1935 = vmatpush3.bf16.msra.mxu1 %v1989_v47 }
 0x107   : > { %870 = vst.msk [vmem:[#allocation2 + $0xe8] sm:$0xff] %vm491_vm1, %v795_v2  ;;  %v796_v7 = vmax.f32 %v764_v3, 0.0  ;;  %v1920_v8 = vpop.f32.mrb[16].mxu0  ;;  %v962_v10 = vld [vmem:[#allocation2 + $0xc9] ss:$2 sm:$0xff] }
 0x108   : > { %873 = vst.msk [vmem:[#allocation2 + $0x110] sm:$0xff] %vm491_vm1, %v798_v5  ;;  %v730_v11 = vmul.f32 %v1920_v8, %v2170_v51  ;;  %v642_v12 = vpop.f32.mrb[17].mxu0  ;;  %v972_v14 = vpack.c.bf16 %v962_v10, %v960_v9  ;;  %v897_v25 = vld [vmem:[#allocation2 + $0xc7] ss:$2 sm:$0xff]  ;;  %v1166_v56 = vld [vmem:[#allocation2 + $0xc8] ss:$2 sm:$0xff] }
 0x109   : > { %871 = vst.msk [vmem:[#allocation2 + $0xf0] sm:$0xff] %vm491_vm1, %v796_v7  ;;  %v728_v15 = vmul.f32 %v2170_v51, %v642_v12  ;;  %v1921_v16 = vpop.f32.mrb[18].mxu0  ;;  %v907_v29 = vpack.c.bf16 %v897_v25, %v895_v24  ;;  %v1125_v37 = vld [vmem:[#allocation2 + $0xc7] ss:$2 sm:$0xff]  ;;  %v921_v63 = vld [vmem:[#allocation2 + $0xc8] ss:$2 sm:$0xff] }
 0x10a   : > { %v769_v18 = vadd.f32 %v2175_v53, %v730_v11  ;;  %v731_v19 = vmul.f32 %v1921_v16, %v2170_v51  ;;  %1226 = vrot.lane.b32.xlu0 %v1218_v13, %s2005_s24  ;;  %981 = vrot.lane.b32.xlu1 %v972_v14, %s2001_s20  ;;  %v645_v20 = vpop.f32.mrb[19].mxu0  ;;  %v1001_v5 = vld [vmem:[#allocation2 + $0xa7] ss:$2 sm:$0xff]  ;;  %v931_v8 = vpack.c.bf16 %v921_v63, %v919_v4  ;;  %v1991_v25 = vld [vmem:[%s2429_s4 + $0x10] ss:$0 sps:$4 sm:$0x33]  }
 0x10b   : > { %v767_v21 = vadd.f32 %v2175_v53, %v728_v15  ;;  %v729_v22 = vmul.f32 %v2170_v51, %v645_v20  ;;  %911 = vst.msk [vmem:[#allocation3 + $0x8] sm:$0xff] %vm491_vm1, %v907_v29  ;;  %v1990_v11 = vld [vmem:[%s2429_s4 + $0x8] sm:$0xff]   ;;  %v1281_v34 = vsel %vm540_vm0, %v1991_v25, 0 }
 0x10c   : > { %v801_v26 = vmax.f32 %v769_v18, 0.0  ;;  %v770_v27 = vadd.f32 %v2175_v53, %v731_v19  ;;  %v1207_v14 = vld [vmem:[#allocation2 + $0xc9] ss:$2 sm:$0xff]  ;;  %v1042_v19 = vld [vmem:[#allocation2 + $0xa8] ss:$2 sm:$0xff]  ;;  %1936 = vmatprep.subr.bf16.mxu1 %v1990_v11 }
 0x10d   : > { %v799_v30 = vmax.f32 %v767_v21, 0.0  ;;  %v768_v31 = vadd.f32 %v2175_v53, %v729_v22  ;;  %1937 = vmatpush3.bf16.msra.mxu1 %v1990_v11 }
 0x10e   : > { %876 = vst.msk [vmem:[#allocation2 + $0x148] sm:$0xff] %vm491_vm1, %v801_v26  ;;  %v802_v33 = vmax.f32 %v770_v27, 0.0  ;;  %1020 = vrot.lane.b32.xlu0 %v1012_v28, %s2006_s27  ;;  %1969 = vmatprep.subr.msk.bf16.mxu1 %vm540_vm0, %v1991_v25 }
 0x10f   : > { %874 = vst.msk [vmem:[#allocation2 + $0x128] sm:$0xff] %vm491_vm1, %v799_v30  ;;  %v800_v35 = vmax.f32 %v768_v31, 0.0  ;;  %v1924_v36 = vpop.f32.mrb[20].mxu0  ;;  %v1127_v38 = vld [vmem:[#allocation2 + $0x107] ss:$2 sm:$0xff] }
 0x110   : > { %877 = vst.msk [vmem:[#allocation2 + $0x150] sm:$0xff] %vm491_vm1, %v802_v33  ;;  %v734_v39 = vmul.f32 %v1924_v36, %v2170_v51  ;;  %v658_v40 = vpop.f32.mrb[21].mxu0  ;;  %v1137_v42 = vpack.c.bf16 %v1127_v38, %v1125_v37  ;;  %v1168_v46 = vld [vmem:[#allocation2 + $0x108] ss:$2 sm:$0xff]  ;;  %v1003_v0 = vld [vmem:[#allocation2 + $0xe7] ss:$2 sm:$0xff] }
 0x111   : > { %875 = vst.msk [vmem:[#allocation2 + $0x130] sm:$0xff] %vm491_vm1, %v800_v35  ;;  %v732_v43 = vmul.f32 %v2170_v51, %v658_v40  ;;  %v1925_v44 = vpop.f32.mrb[22].mxu0  ;;  %v1178_v60 = vpack.c.bf16 %v1168_v46, %v1166_v56  ;;  %v1013_v9 = vpack.c.bf16 %v1003_v0, %v1001_v5  ;;  %v1209_v10 = vld [vmem:[#allocation2 + $0x109] ss:$2 sm:$0xff]  ;;  %v1044_v15 = vld [vmem:[#allocation2 + $0xe8] ss:$2 sm:$0xff]  ;;  %1939 = vmatpush3.bf16.msra.mxu1 %v1281_v34 }
 0x112   : > { %v773_v48 = vadd.f32 %v2175_v53, %v734_v39  ;;  %v735_v49 = vmul.f32 %v1925_v44, %v2170_v51  ;;  %1061 = vrot.lane.b32.xlu0 %v1053_v41, %s2007_s30  ;;  %1146 = vrot.lane.b32.xlu1 %v1137_v42, %s2003_s22  ;;  %v661_v50 = vpop.f32.mrb[23].mxu0  ;;  %v899_v20 = vld [vmem:[#allocation2 + $0x107] ss:$2 sm:$0xff]  ;;  %v1219_v23 = vpack.c.bf16 %v1209_v10, %v1207_v14  ;;  %v923_v55 = vld [vmem:[#allocation2 + $0x108] ss:$2 sm:$0xff] }
 0x113   : > { %v771_v52 = vadd.f32 %v2175_v53, %v732_v43  ;;  %v733_v54 = vmul.f32 %v2170_v51, %v661_v50  ;;  %v1054_v28 = vpack.c.bf16 %v1044_v15, %v1042_v19  ;;  %v1085_v32 = vld [vmem:[#allocation2 + $0xe9] ss:$2 sm:$0xff] }
 0x114   : > { %v805_v57 = vmax.f32 %v773_v48, 0.0  ;;  %v774_v58 = vadd.f32 %v2175_v53, %v735_v49  ;;  %v1083_v38 = vld [vmem:[#allocation2 + $0xa9] ss:$2 sm:$0xff] }
 0x115   : > { %v803_v61 = vmax.f32 %v771_v52, 0.0  ;;  %v772_v62 = vadd.f32 %v2175_v53, %v733_v54  ;;  %v964_v39 = vld [vmem:[#allocation2 + $0x109] ss:$2 sm:$0xff]  ;;  %v1095_v42 = vpack.c.bf16 %v1085_v32, %v1083_v38 }
 0x116   : > { %880 = vst.msk [vmem:[#allocation2 + $0x188] sm:$0xff] %vm491_vm1, %v805_v57  ;;  %v806_v1 = vmax.f32 %v774_v58, 0.0  ;;  %1102 = vrot.lane.b32.xlu0 %v1094_v59, %s2008_s14  ;;  %1187 = vrot.lane.b32.xlu1 %v1178_v60, %s2004_s23 }
 0x117   : > { %878 = vst.msk [vmem:[#allocation2 + $0x168] sm:$0xff] %vm491_vm1, %v803_v61  ;;  %v804_v2 = vmax.f32 %v772_v62, 0.0  ;;  %v1928_v3 = vpop.f32.mrb[24].mxu0  ;;  %v901_v24 = vld [vmem:[#allocation2 + $0x147] ss:$2 sm:$0xff] }
 0x118   : > { %881 = vst.msk [vmem:[#allocation2 + $0x190] sm:$0xff] %vm491_vm1, %v806_v1  ;;  %v738_v6 = vmul.f32 %v1928_v3, %v2170_v51  ;;  %v674_v7 = vpop.f32.mrb[25].mxu0  ;;  %v908_v29 = vpack.c.bf16 %v901_v24, %v899_v20  ;;  %v966_v33 = vld [vmem:[#allocation2 + $0x149] ss:$2 sm:$0xff]  ;;  %v925_v46 = vld [vmem:[#allocation2 + $0x148] ss:$2 sm:$0xff] }
 0x119   : > { %879 = vst.msk [vmem:[#allocation2 + $0x170] sm:$0xff] %vm491_vm1, %v804_v2  ;;  %v736_v12 = vmul.f32 %v2170_v51, %v674_v7  ;;  %v1929_v13 = vpop.f32.mrb[26].mxu0  ;;  %v973_v43 = vpack.c.bf16 %v966_v33, %v964_v39  ;;  %v1129_v56 = vld [vmem:[#allocation2 + $0x147] ss:$2 sm:$0xff]  ;;  %v932_v59 = vpack.c.bf16 %v925_v46, %v923_v55  ;;  %v1170_v1 = vld [vmem:[#allocation2 + $0x148] ss:$2 sm:$0xff] }
 0x11a   : > { %v777_v16 = vadd.f32 %v2175_v53, %v738_v6  ;;  %v739_v17 = vmul.f32 %v1929_v13, %v2170_v51  ;;  %940 = vrot.lane.b32.xlu0 %v931_v8, %s2002_s21  ;;  %1022 = vrot.lane.b32.xlu1 %v1013_v9, %s2006_s27  ;;  %v677_v18 = vpop.f32.mrb[27].mxu0  ;;  %912 = vst.msk [vmem:[#allocation3 + $0x10] sm:$0xff] %vm491_vm1, %v908_v29  ;;  %v1005_v9 = vld [vmem:[#allocation2 + $0x127] ss:$2 sm:$0xff]  ;;  %v1046_v15 = vld [vmem:[#allocation2 + $0x128] ss:$2 sm:$0xff] }
 0x11b   : > { %v775_v21 = vadd.f32 %v2175_v53, %v736_v12  ;;  %v737_v22 = vmul.f32 %v2170_v51, %v677_v18 }
 0x11c   : > { %v809_v26 = vmax.f32 %v777_v16, 0.0  ;;  %v778_v27 = vadd.f32 %v2175_v53, %v739_v17 }
 0x11d   : > { %v807_v30 = vmax.f32 %v775_v21, 0.0  ;;  %v776_v31 = vadd.f32 %v2175_v53, %v737_v22  ;;  %v1087_v22 = vld [vmem:[#allocation2 + $0x129] ss:$2 sm:$0xff] }
 0x11e   : > { %884 = vst.msk [vmem:[#allocation2 + $0x1c8] sm:$0xff] %vm491_vm1, %v809_v26  ;;  %v810_v35 = vmax.f32 %v778_v27, 0.0  ;;  %1228 = vrot.lane.b32.xlu0 %v1219_v23, %s2005_s24  ;;  %1063 = vrot.lane.b32.xlu1 %v1054_v28, %s2007_s30  ;;  %v1211_v28 = vld [vmem:[#allocation2 + $0x149] ss:$2 sm:$0xff] }
 0x11f   : > { %882 = vst.msk [vmem:[#allocation2 + $0x1a8] sm:$0xff] %vm491_vm1, %v807_v30  ;;  %v808_v36 = vmax.f32 %v776_v31, 0.0  ;;  %v1932_v37 = vpop.f32.mrb[28].mxu0  ;;  %v1131_v47 = vld [vmem:[#allocation2 + $0x187] ss:$2 sm:$0xff] }
 0x120   : > { %885 = vst.msk [vmem:[#allocation2 + $0x1d0] sm:$0xff] %vm491_vm1, %v810_v35  ;;  %v742_v40 = vmul.f32 %v1932_v37, %v2170_v51  ;;  %v690_v41 = vpop.f32.mrb[29].mxu0  ;;  %v1138_v60 = vpack.c.bf16 %v1131_v47, %v1129_v56  ;;  %v1172_v63 = vld [vmem:[#allocation2 + $0x188] ss:$2 sm:$0xff]  ;;  %v903_v7 = vld [vmem:[#allocation2 + $0x187] ss:$2 sm:$0xff] }
 0x121   : > { %883 = vst.msk [vmem:[#allocation2 + $0x1b0] sm:$0xff] %vm491_vm1, %v808_v36  ;;  %v740_v44 = vmul.f32 %v2170_v51, %v690_v41  ;;  %v1933_v45 = vpop.f32.mrb[30].mxu0  ;;  %v927_v2 = vld [vmem:[#allocation2 + $0x188] ss:$2 sm:$0xff]  ;;  %v1179_v4 = vpack.c.bf16 %v1172_v63, %v1170_v1  ;;  %v968_v10 = vld [vmem:[#allocation2 + $0x189] ss:$2 sm:$0xff] }
 0x122   : > { %v781_v48 = vadd.f32 %v2175_v53, %v742_v40  ;;  %v743_v49 = vmul.f32 %v1933_v45, %v2170_v51  ;;  %1104 = vrot.lane.b32.xlu1 %v1095_v42, %s2008_s14  ;;  %983 = vrot.lane.b32.xlu0 %v973_v43, %s2001_s20  ;;  %v693_v50 = vpop.f32.mrb[31].mxu0  ;;  %v1048_v14 = vld [vmem:[#allocation2 + $0x168] ss:$2 sm:$0xff]  ;;  %v1089_v20 = vld [vmem:[#allocation2 + $0x169] ss:$2 sm:$0xff] }
 0x123   : > { %v779_v52 = vadd.f32 %v2175_v53, %v740_v44  ;;  %v741_v54 = vmul.f32 %v2170_v51, %v693_v50  ;;  %v1055_v18 = vpack.c.bf16 %v1048_v14, %v1046_v15  ;;  %v1096_v24 = vpack.c.bf16 %v1089_v20, %v1087_v22  ;;  %v1213_v26 = vld [vmem:[#allocation2 + $0x189] ss:$2 sm:$0xff]  ;;  %v1520_v15 = vld [vmem:[%s2435_s10] sm:$0x3] }
 0x124   : > { %v813_v57 = vmax.f32 %v781_v48, 0.0  ;;  %v782_v58 = vadd.f32 %v2175_v53, %v743_v49  ;;  %v1220_v30 = vpack.c.bf16 %v1213_v26, %v1211_v28 }
 0x125   : > { %v811_v61 = vmax.f32 %v779_v52, 0.0  ;;  %v780_v62 = vadd.f32 %v2175_v53, %v741_v54  ;;  %v1007_v53 = vld [vmem:[#allocation2 + $0x167] ss:$2 sm:$0xff] }
 0x126   : > { %888 = vst.msk [vmem:[#allocation2 + $0x208] sm:$0xff] %vm491_vm1, %v813_v57  ;;  %v814_v0 = vmax.f32 %v782_v58, 0.0  ;;  %942 = vrot.lane.b32.xlu1 %v932_v59, %s2002_s21  ;;  %1148 = vrot.lane.b32.xlu0 %v1138_v60, %s2003_s22  ;;  %v1014_v12 = vpack.c.bf16 %v1007_v53, %v1005_v9 }
 0x127   : > { %886 = vst.msk [vmem:[#allocation2 + $0x1e8] sm:$0xff] %vm491_vm1, %v811_v61  ;;  %v812_v51 = vmax.f32 %v780_v62, 0.0  ;;  %v929_v3 = vld [vmem:[#allocation2 + $0x1c8] ss:$2 sm:$0xff]  ;;  %v970_v6 = vld [vmem:[#allocation2 + $0x1c9] ss:$2 sm:$0xff] }
 0x128   : > { %889 = vst.msk [vmem:[#allocation2 + $0x210] sm:$0xff] %vm491_vm1, %v814_v0  ;;  %v933_v5 = vpack.c.bf16 %v929_v3, %v927_v2  ;;  %v905_v8 = vld [vmem:[#allocation2 + $0x1c7] ss:$2 sm:$0xff]  ;;  %v974_v13 = vpack.c.bf16 %v970_v6, %v968_v10  ;;  %v1174_v23 = vld [vmem:[#allocation2 + $0x1c8] ss:$2 sm:$0xff] }
 0x129   : > { %887 = vst.msk [vmem:[#allocation2 + $0x1f0] sm:$0xff] %vm491_vm1, %v812_v51  ;;  %v909_v11 = vpack.c.bf16 %v905_v8, %v903_v7  ;;  %v1133_v16 = vld [vmem:[#allocation2 + $0x1c7] ss:$2 sm:$0xff]  ;;  %v1050_v33 = vld [vmem:[#allocation2 + $0x1a8] ss:$2 sm:$0xff] }
 0x12a   : > { %1189 = vrot.lane.b32.xlu0 %v1179_v4, %s2004_s23  ;;  %944 = vrot.lane.b32.xlu1 %v933_v5, %s2002_s21  ;;  %v1009_v29 = vld [vmem:[#allocation2 + $0x1a7] ss:$2 sm:$0xff]  ;;  %s1857_s21 = sshll.u32 %s2440_s26, 5 }
 0x12b   : > { %913 = vst.msk [vmem:[#allocation3 + $0x18] sm:$0xff] %vm491_vm1, %v909_v11  ;;  %v1091_v36 = vld [vmem:[#allocation2 + $0x1a9] ss:$2 sm:$0xff] }
 0x12c   : > { %v1215_v39 = vld [vmem:[#allocation2 + $0x1c9] ss:$2 sm:$0xff] }
 0x12e   : > { %1024 = vrot.lane.b32.xlu0 %v1014_v12, %s2006_s27  ;;  %985 = vrot.lane.b32.xlu1 %v974_v13, %s2001_s20  ;;  %v1390_v13 = vld [vmem:[%s2432_s7] sm:$0x3] }
 0x12f   : > { %v1135_v17 = vld [vmem:[#allocation2 + $0x207] ss:$2 sm:$0xff]  ;;  %v1176_v21 = vld [vmem:[#allocation2 + $0x208] ss:$2 sm:$0xff]  ;;  %1970 = vmatprep.subr.msk.bf16.mxu1 %vm540_vm0, %v1390_v13  ;;  %v1404_v14 = vsel %vm540_vm0, %v1390_v13, 0 }
 0x130   : > { %v1139_v19 = vpack.c.bf16 %v1135_v17, %v1133_v16  ;;  %v1180_v25 = vpack.c.bf16 %v1176_v21, %v1174_v23  ;;  %v1011_v27 = vld [vmem:[#allocation2 + $0x1e7] ss:$2 sm:$0xff]  ;;  %v1052_v32 = vld [vmem:[#allocation2 + $0x1e8] ss:$2 sm:$0xff]  ;;  %v1825_v16 = vld [vmem:[%s2430_s5] ss:$0 sm:$0xff] }
 0x131   : > { %v1015_v31 = vpack.c.bf16 %v1011_v27, %v1009_v29  ;;  %v1056_v34 = vpack.c.bf16 %v1052_v32, %v1050_v33  ;;  %v1093_v35 = vld [vmem:[#allocation2 + $0x1e9] ss:$2 sm:$0xff] }
 0x132   : > { %1065 = vrot.lane.b32.xlu0 %v1055_v18, %s2007_s30  ;;  %1150 = vrot.lane.b32.xlu1 %v1139_v19, %s2003_s22  ;;  %v1097_v37 = vpack.c.bf16 %v1093_v35, %v1091_v36  ;;  %v1217_v38 = vld [vmem:[#allocation2 + $0x209] ss:$2 sm:$0xff]  ;;  %v1826_v18 = vld [vmem:[%s2431_s6] ss:$0 sm:$0xff]  ;;  %v1534_v36 = vsel %vm540_vm0, %v1520_v15, 0 }
 0x133   : > { %v1221_v40 = vpack.c.bf16 %v1217_v38, %v1215_v39 }
 0x136   : > { %1106 = vrot.lane.b32.xlu0 %v1096_v24, %s2008_s14  ;;  %1191 = vrot.lane.b32.xlu1 %v1180_v25, %s2004_s23 }
 0x13a   : > { %1230 = vrot.lane.b32.xlu0 %v1220_v30, %s2005_s24  ;;  %1026 = vrot.lane.b32.xlu1 %v1015_v31, %s2006_s27 }
 0x13e   : > { %1067 = vrot.lane.b32.xlu1 %v1056_v34, %s2007_s30 }
 0x142   : > { %1108 = vrot.lane.b32.xlu1 %v1097_v37, %s2008_s14 }
 0x146   : > { %1232 = vrot.lane.b32.xlu1 %v1221_v40, %s2005_s24  ;;  %s2404_s24 = scalar_lea.vmem %s2438_s13, %s1857_s21 }
 0x16c   : > { %v980_v41 = vpop.permute.xlu1 %979 }
 0x16d   : > { %v939_v42 = vpop.permute.xlu0 %938 }
 0x16e   : > { %951 = vst.msk [vmem:[#allocation3] sm:$0xff] %vm950_vm3, %v939_v42 }
 0x16f   : > { %992 = vst.msk [vmem:[#allocation3] sm:$0xff] %vm991_vm4, %v980_v41 }
 0x174   : > { %v1145_v43 = vpop.permute.xlu0 %1144 }
 0x178   : > { %v1186_v44 = vpop.permute.xlu0 %1185 }
 0x17c   : > { %v1227_v45 = vpop.permute.xlu0 %1226  ;;  %v982_v46 = vpop.permute.xlu1 %981 }
 0x180   : > { %v1021_v47 = vpop.permute.xlu0 %1020 }
 0x181   : > { %1033 = vst.msk [vmem:[#allocation3] sm:$0xff] %vm1032_vm5, %v1021_v47 }
 0x184   : > { %v1062_v48 = vpop.permute.xlu0 %1061  ;;  %v1147_v49 = vpop.permute.xlu1 %1146 }
 0x185   : > { %1074 = vst.msk [vmem:[#allocation3] sm:$0xff] %vm1073_vm6, %v1062_v48 }
 0x188   : > { %v1103_v50 = vpop.permute.xlu0 %1102  ;;  %v1188_v52 = vpop.permute.xlu1 %1187 }
 0x189   : > { %1115 = vst.msk [vmem:[#allocation3] sm:$0xff] %vm1114_vm7, %v1103_v50 }
 0x18a   : > { %1157 = vst.msk [vmem:[#allocation3] sm:$0xff] %vm1156_vm8, %v1145_v43 }
 0x18b   : > { %1198 = vst.msk [vmem:[#allocation3] sm:$0xff] %vm1197_vm9, %v1186_v44 }
 0x18c   : > { %1239 = vst.msk [vmem:[#allocation3] sm:$0xff] %vm1238_vm10, %v1227_v45  ;;  %v941_v54 = vpop.permute.xlu0 %940  ;;  %v1023_v55 = vpop.permute.xlu1 %1022 }
 0x18d   : > { %952 = vst.msk [vmem:[#allocation3 + $0x8] sm:$0xff] %vm950_vm3, %v941_v54  ;;  %v1833_v54 = vld [vmem:[%s2098_s15 + $0x20] ss:$2 sm:$0xff] }
 0x18e   : > { %993 = vst.msk [vmem:[#allocation3 + $0x8] sm:$0xff] %vm991_vm4, %v982_v46 }
 0x18f   : > { %1034 = vst.msk [vmem:[#allocation3 + $0x8] sm:$0xff] %vm1032_vm5, %v1023_v55 }
 0x190   : > { %v1229_v56 = vpop.permute.xlu0 %1228  ;;  %v1064_v57 = vpop.permute.xlu1 %1063 }
 0x191   : > { %1075 = vst.msk [vmem:[#allocation3 + $0x8] sm:$0xff] %vm1073_vm6, %v1064_v57 }
 0x193   : > { %v1243_v58 = vld [vmem:[#allocation3] sm:$0xff] }
 0x194   : > { %1940 = vmatprep.mubr.msk.bf16.mxu1 %vm1267_vm11, %v1243_v58  ;;  %v1105_v59 = vpop.permute.xlu1 %1104  ;;  %v984_v60 = vpop.permute.xlu0 %983 }
 0x195   : > { %1116 = vst.msk [vmem:[#allocation3 + $0x8] sm:$0xff] %vm1114_vm7, %v1105_v59 }
 0x196   : > { %1158 = vst.msk [vmem:[#allocation3 + $0x8] sm:$0xff] %vm1156_vm8, %v1147_v49 }
 0x197   : > { %1199 = vst.msk [vmem:[#allocation3 + $0x8] sm:$0xff] %vm1197_vm9, %v1188_v52  ;;  %v1501_v52 = vld [vmem:[%s2098_s15] ss:$2 sm:$0xff] }
 0x198   : > { %1240 = vst.msk [vmem:[#allocation3 + $0x8] sm:$0xff] %vm1238_vm10, %v1229_v56  ;;  %v943_v61 = vpop.permute.xlu1 %942  ;;  %v1149_v62 = vpop.permute.xlu0 %1148  ;;  %v1516_v59 = vpack.c.bf16 %v1833_v54, %v1501_v52 }
 0x199   : > { %953 = vst.msk [vmem:[#allocation3 + $0x10] sm:$0xff] %vm950_vm3, %v943_v61  ;;  %v1835_v61 = vld [vmem:[%s2098_s15 + $0x60] ss:$2 sm:$0xff] }
 0x19a   : > { %994 = vst.msk [vmem:[#allocation3 + $0x10] sm:$0xff] %vm991_vm4, %v984_v60  ;;  %v1834_v60 = vld [vmem:[%s2098_s15 + $0x40] ss:$2 sm:$0xff] }
 0x19c   : > { %v1190_v63 = vpop.permute.xlu0 %1189  ;;  %v945_v0 = vpop.permute.xlu1 %944 }
 0x19d   : > { %954 = vst.msk [vmem:[#allocation3 + $0x18] sm:$0xff] %vm950_vm3, %v945_v0  ;;  %v1517_v0 = vpack.c.bf16 %v1835_v61, %v1834_v60 }
 0x19f   : > { %v1244_v1 = vld [vmem:[#allocation3 + $0x8] sm:$0xff] }
 0x1a0   : > { %1941 = vmatmul.mubr.msk.bf16.vlgmr.msra.gmra.mrb[0].mxu1 %vm1267_vm11, %v1244_v1  ;;  %v1025_v51 = vpop.permute.xlu0 %1024  ;;  %v986_v2 = vpop.permute.xlu1 %985 }
 0x1a1   : > { %1035 = vst.msk [vmem:[#allocation3 + $0x10] sm:$0xff] %vm1032_vm5, %v1025_v51  ;;  %1949 = vmatpush3.bf16.msra.mxu1 %v1404_v14  ;;  %v1838_v51 = vld [vmem:[%s2098_s15 + $0xc0] ss:$2 sm:$0xff] }
 0x1a2   : > { %995 = vst.msk [vmem:[#allocation3 + $0x18] sm:$0xff] %vm991_vm4, %v986_v2  ;;  %1971 = vmatprep.subr.msk.bf16.mxu1 %vm540_vm0, %v1520_v15  ;;  %v1839_v2 = vld [vmem:[%s2098_s15 + $0xe0] ss:$2 sm:$0xff] }
 0x1a3   : > { %v1832_v14 = vld [vmem:[%s2434_s9] ss:$0 sm:$0xff] }
 0x1a4   : > { %v1066_v3 = vpop.permute.xlu0 %1065  ;;  %v1151_v4 = vpop.permute.xlu1 %1150 }
 0x1a5   : > { %1076 = vst.msk [vmem:[#allocation3 + $0x10] sm:$0xff] %vm1073_vm6, %v1066_v3  ;;  %v1519_v3 = vpack.c.bf16 %v1839_v2, %v1838_v51 }
 0x1a8   : > { %v1107_v5 = vpop.permute.xlu0 %1106  ;;  %v1192_v53 = vpop.permute.xlu1 %1191 }
 0x1a9   : > { %1117 = vst.msk [vmem:[#allocation3 + $0x10] sm:$0xff] %vm1114_vm7, %v1107_v5 }
 0x1aa   : > { %1159 = vst.msk [vmem:[#allocation3 + $0x10] sm:$0xff] %vm1156_vm8, %v1149_v62  ;;  %v1836_v62 = vld [vmem:[%s2098_s15 + $0x80] ss:$2 sm:$0xff] }
 0x1ab   : > { %1200 = vst.msk [vmem:[#allocation3 + $0x10] sm:$0xff] %vm1197_vm9, %v1190_v63  ;;  %v1837_v63 = vld [vmem:[%s2098_s15 + $0xa0] ss:$2 sm:$0xff] }
 0x1ac   : > { %v1231_v6 = vpop.permute.xlu0 %1230  ;;  %v1027_v7 = vpop.permute.xlu1 %1026  ;;  %v1518_v1 = vpack.c.bf16 %v1837_v63, %v1836_v62 }
 0x1ad   : > { %1241 = vst.msk [vmem:[#allocation3 + $0x10] sm:$0xff] %vm1238_vm10, %v1231_v6 }
 0x1ae   : > { %1036 = vst.msk [vmem:[#allocation3 + $0x18] sm:$0xff] %vm1032_vm5, %v1027_v7 }
 0x1b0   : > { %v1068_v8 = vpop.permute.xlu1 %1067 }
 0x1b1   : > { %1077 = vst.msk [vmem:[#allocation3 + $0x18] sm:$0xff] %vm1073_vm6, %v1068_v8 }
 0x1b4   : > { %v1109_v9 = vpop.permute.xlu1 %1108  ;;  %v1245_v10 = vld [vmem:[#allocation3 + $0x10] sm:$0xff] }
 0x1b5   : > { %1118 = vst.msk [vmem:[#allocation3 + $0x18] sm:$0xff] %vm1114_vm7, %v1109_v9  ;;  %1944 = vmatprep.mubr.msk.bf16.mxu1 %vm1267_vm11, %v1245_v10 }
 0x1b6   : > { %1160 = vst.msk [vmem:[#allocation3 + $0x18] sm:$0xff] %vm1156_vm8, %v1151_v4 }
 0x1b7   : > { %1201 = vst.msk [vmem:[#allocation3 + $0x18] sm:$0xff] %vm1197_vm9, %v1192_v53 }
 0x1b8   : > { %v1233_v11 = vpop.permute.xlu1 %1232 }
 0x1b9   : > { %1242 = vst.msk [vmem:[#allocation3 + $0x18] sm:$0xff] %vm1238_vm10, %v1233_v11  ;;  %v1831_v11 = vld [vmem:[%s2433_s8] ss:$0 sm:$0xff] }
 0x1c0   : > { %v1246_v12 = vld [vmem:[#allocation3 + $0x18] sm:$0xff] }
 0x1c1   : > { %1945 = vmatmul.mubr.msk.bf16.gmra.mrb[4].mxu1 %vm1267_vm11, %v1246_v12  ;;  %v1844_v12 = vld [vmem:[%s2436_s11] ss:$0 sm:$0xff] }
 0x273   : > { %v1942_v17 = vpop.f32.mrb[0].mxu1 }
 0x274   : > { %v1357_v19 = vmul.f32 %v1942_v17, %v1825_v16  ;;  %v1317_v20 = vpop.f32.mrb[1].mxu1  ;;  %v1845_v17 = vld [vmem:[%s2437_s12] ss:$0 sm:$0xff] }
 0x275   : > { %v1355_v21 = vmul.f32 %v1825_v16, %v1317_v20  ;;  %v1943_v22 = vpop.f32.mrb[2].mxu1 }
 0x276   : > { %v1372_v23 = vadd.f32 %v1826_v18, %v1357_v19  ;;  %v1358_v24 = vmul.f32 %v1943_v22, %v1825_v16  ;;  %v1320_v25 = vpop.f32.mrb[3].mxu1 }
 0x277   : > { %v1370_v26 = vadd.f32 %v1826_v18, %v1355_v21  ;;  %v1356_v27 = vmul.f32 %v1825_v16, %v1320_v25 }
 0x278   : > { %v1373_v28 = vadd.f32 %v1826_v18, %v1358_v24  ;;  %v1380_v30 = vmax.f32 %v1372_v23, 0.0 }
 0x279   : > { %v1371_v29 = vadd.f32 %v1826_v18, %v1356_v27  ;;  %v1378_v32 = vmax.f32 %v1370_v26, 0.0 }
 0x27a   : > { %v1381_v31 = vmax.f32 %v1373_v28, 0.0 }
 0x27b   : > { %v1379_v33 = vmax.f32 %v1371_v29, 0.0 }
 0x27c   : > { %v1387_v34 = vpack.c.bf16 %v1381_v31, %v1380_v30 }
 0x27d   : > { %v1386_v35 = vpack.c.bf16 %v1379_v33, %v1378_v32 }
 0x27f   : > { %1950 = vmatprep.mubr.msk.bf16.mxu1 %vm491_vm1, %v1386_v35 }
 0x280   : > { %1951 = vmatmul.mubr.msk.bf16.vlgmr.msra.gmra.mrb[8].mxu1 %vm491_vm1, %v1387_v34 }
 0x281   : > { %1959 = vmatpush3.bf16.msra.mxu1 %v1534_v36 }
 0x294   : > { %v1946_v37 = vpop.f32.mrb[4].mxu1 }
 0x295   : > { %v1361_v38 = vmul.f32 %v1946_v37, %v1825_v16  ;;  %v1333_v39 = vpop.f32.mrb[5].mxu1 }
 0x296   : > { %v1359_v40 = vmul.f32 %v1825_v16, %v1333_v39  ;;  %v1947_v41 = vpop.f32.mrb[6].mxu1 }
 0x297   : > { %v1376_v42 = vadd.f32 %v1826_v18, %v1361_v38  ;;  %v1362_v43 = vmul.f32 %v1947_v41, %v1825_v16  ;;  %v1336_v44 = vpop.f32.mrb[7].mxu1 }
 0x298   : > { %v1374_v45 = vadd.f32 %v1826_v18, %v1359_v40  ;;  %v1360_v46 = vmul.f32 %v1825_v16, %v1336_v44 }
 0x299   : > { %v1377_v47 = vadd.f32 %v1826_v18, %v1362_v43  ;;  %v1384_v49 = vmax.f32 %v1376_v42, 0.0 }
 0x29a   : > { %v1375_v48 = vadd.f32 %v1826_v18, %v1360_v46  ;;  %v1382_v55 = vmax.f32 %v1374_v45, 0.0 }
 0x29b   : > { %v1385_v50 = vmax.f32 %v1377_v47, 0.0 }
 0x29c   : > { %v1383_v56 = vmax.f32 %v1375_v48, 0.0 }
 0x29d   : > { %v1389_v57 = vpack.c.bf16 %v1385_v50, %v1384_v49 }
 0x29e   : > { %v1388_v58 = vpack.c.bf16 %v1383_v56, %v1382_v55 }
 0x2a0   : > { %1954 = vmatprep.mubr.msk.bf16.mxu1 %vm491_vm1, %v1388_v58 }
 0x2a1   : > { %1955 = vmatmul.mubr.msk.bf16.gmra.mrb[12].mxu1 %vm491_vm1, %v1389_v57 }
 0x2a2   : > { %1960 = vmatprep.mubr.msk.bf16.mxu1 %vm491_vm1, %v1516_v59 }
 0x2a9   : > { %1961 = vmatmul.mubr.msk.bf16.vlgmr.msra.gmra.mrb[16].mxu1 %vm491_vm1, %v1517_v0 }
 0x2aa   : > { %1964 = vmatprep.mubr.msk.bf16.mxu1 %vm491_vm1, %v1518_v1 }
 0x2b1   : > { %1965 = vmatmul.mubr.msk.bf16.gmra.mrb[20].mxu1 %vm491_vm1, %v1519_v3 }
 0x353   : > { %v1952_v4 = vpop.f32.mrb[8].mxu1 }
 0x354   : > { %v1440_v5 = vpop.f32.mrb[9].mxu1  ;;  %v1480_v13 = vmul.f32 %v1952_v4, %v1831_v11 }
 0x355   : > { %v1953_v53 = vpop.f32.mrb[10].mxu1  ;;  %v1478_v15 = vmul.f32 %v1831_v11, %v1440_v5 }
 0x356   : > { %v1443_v6 = vpop.f32.mrb[11].mxu1  ;;  %v1481_v18 = vmul.f32 %v1953_v53, %v1831_v11  ;;  %v1495_v24 = vadd.f32 %v1832_v14, %v1480_v13 }
 0x357   : > { %v1479_v21 = vmul.f32 %v1831_v11, %v1443_v6  ;;  %v1493_v28 = vadd.f32 %v1832_v14, %v1478_v15 }
 0x358   : > { %v1496_v31 = vadd.f32 %v1832_v14, %v1481_v18 }
 0x359   : > { %v1494_v34 = vadd.f32 %v1832_v14, %v1479_v21 }
 0x374   : > { %v1956_v7 = vpop.f32.mrb[12].mxu1 }
 0x375   : > { %v1456_v8 = vpop.f32.mrb[13].mxu1  ;;  %v1484_v37 = vmul.f32 %v1956_v7, %v1831_v11 }
 0x376   : > { %v1957_v9 = vpop.f32.mrb[14].mxu1  ;;  %v1482_v40 = vmul.f32 %v1831_v11, %v1456_v8 }
 0x377   : > { %v1459_v10 = vpop.f32.mrb[15].mxu1  ;;  %v1485_v44 = vmul.f32 %v1957_v9, %v1831_v11  ;;  %v1499_v56 = vadd.f32 %v1832_v14, %v1484_v37 }
 0x378   : > { %v1483_v49 = vmul.f32 %v1831_v11, %v1459_v10  ;;  %v1497_v61 = vadd.f32 %v1832_v14, %v1482_v40 }
 0x379   : > { %v1500_v1 = vadd.f32 %v1832_v14, %v1485_v44 }
 0x37a   : > { %v1498_v3 = vadd.f32 %v1832_v14, %v1483_v49 }
 0x37c   : > { %v1962_v16 = vpop.f32.mrb[16].mxu1 }
 0x37d   : > { %v1610_v19 = vmul.f32 %v1962_v16, %v1844_v12  ;;  %v1570_v20 = vpop.f32.mrb[17].mxu1 }
 0x37e   : > { %v1608_v22 = vmul.f32 %v1844_v12, %v1570_v20  ;;  %v1963_v23 = vpop.f32.mrb[18].mxu1 }
 0x37f   : > { %v1625_v25 = vadd.f32 %v1845_v17, %v1610_v19  ;;  %v1611_v26 = vmul.f32 %v1963_v23, %v1844_v12  ;;  %v1573_v27 = vpop.f32.mrb[19].mxu1 }
 0x380   : > { %v1623_v29 = vadd.f32 %v1845_v17, %v1608_v22  ;;  %v1609_v30 = vmul.f32 %v1844_v12, %v1573_v27 }
 0x381   : > { %v1633_v32 = vadd.f32 %v1625_v25, %v1495_v24  ;;  %v1626_v33 = vadd.f32 %v1845_v17, %v1611_v26 }
 0x382   : > { %v1631_v35 = vadd.f32 %v1623_v29, %v1493_v28  ;;  %v1624_v36 = vadd.f32 %v1845_v17, %v1609_v30 }
 0x383   : > { %v1641_v38 = vmax.f32 %v1633_v32, 0.0  ;;  %v1634_v39 = vadd.f32 %v1626_v33, %v1496_v31 }
 0x384   : > { %v1639_v41 = vmax.f32 %v1631_v35, 0.0  ;;  %v1632_v42 = vadd.f32 %v1624_v36, %v1494_v34  ;;  %v1966_v43 = vpop.f32.mrb[20].mxu1 }
 0x385   : > { %v1860_v45 = vpack.c.bf16 %v1641_v38, %v1641_v38  ;;  %v1642_v46 = vmax.f32 %v1634_v39, 0.0  ;;  %v1614_v47 = vmul.f32 %v1966_v43, %v1844_v12  ;;  %v1586_v48 = vpop.f32.mrb[21].mxu1 }
 0x386   : > { %v1858_v50 = vpack.c.bf16 %v1639_v41, %v1639_v41  ;;  %v1640_v52 = vmax.f32 %v1632_v42, 0.0  ;;  %v1612_v54 = vmul.f32 %v1844_v12, %v1586_v48  ;;  %v1967_v55 = vpop.f32.mrb[22].mxu1 }
 0x387   : > { %1682 = vst.msk [vmem:[%s2404_s24 + $0x8] sm:$0xf] %vm1679_vm12, %v1860_v45  ;;  %v1861_v57 = vpack.c.bf16 %v1642_v46, %v1642_v46  ;;  %v1629_v58 = vadd.f32 %v1845_v17, %v1614_v47  ;;  %v1615_v59 = vmul.f32 %v1967_v55, %v1844_v12  ;;  %v1589_v60 = vpop.f32.mrb[23].mxu1 }
 0x388   : > { %1680 = vst.msk [vmem:[%s2404_s24] sm:$0xf] %vm1679_vm12, %v1858_v50  ;;  %v1859_v62 = vpack.c.bf16 %v1640_v52, %v1640_v52  ;;  %v1627_v63 = vadd.f32 %v1845_v17, %v1612_v54  ;;  %v1613_v0 = vmul.f32 %v1844_v12, %v1589_v60 }
 0x389   : > { %1683 = vst.msk [vmem:[%s2404_s24 + $0xc] sm:$0xf] %vm1679_vm12, %v1861_v57  ;;  %v1637_v51 = vadd.f32 %v1629_v58, %v1499_v56  ;;  %v1630_v2 = vadd.f32 %v1845_v17, %v1615_v59 }
 0x38a   : > { %1681 = vst.msk [vmem:[%s2404_s24 + $0x4] sm:$0xf] %vm1679_vm12, %v1859_v62  ;;  %v1635_v4 = vadd.f32 %v1627_v63, %v1497_v61  ;;  %v1628_v5 = vadd.f32 %v1845_v17, %v1613_v0 }
 0x38b   : > { %v1645_v53 = vmax.f32 %v1637_v51, 0.0  ;;  %v1638_v6 = vadd.f32 %v1630_v2, %v1500_v1 }
 0x38c   : > { %v1643_v7 = vmax.f32 %v1635_v4, 0.0  ;;  %v1636_v8 = vadd.f32 %v1628_v5, %v1498_v3 }
 0x38d   : > { %v1864_v9 = vpack.c.bf16 %v1645_v53, %v1645_v53  ;;  %v1646_v10 = vmax.f32 %v1638_v6, 0.0 }
 0x38e   : > { %v1862_v11 = vpack.c.bf16 %v1643_v7, %v1643_v7  ;;  %v1644_v12 = vmax.f32 %v1636_v8, 0.0 }
 0x38f   : > { %1686 = vst.msk [vmem:[%s2404_s24 + $0x18] sm:$0xf] %vm1679_vm12, %v1864_v9  ;;  %v1865_v13 = vpack.c.bf16 %v1646_v10, %v1646_v10 }
 0x390   : > { %1684 = vst.msk [vmem:[%s2404_s24 + $0x10] sm:$0xf] %vm1679_vm12, %v1862_v11  ;;  %v1863_v14 = vpack.c.bf16 %v1644_v12, %v1644_v12 }
 0x391   : > { %1687 = vst.msk [vmem:[%s2404_s24 + $0x1c] sm:$0xf] %vm1679_vm12, %v1865_v13 }
 0x392   : > { %1685 = vst.msk [vmem:[%s2404_s24 + $0x14] sm:$0xf] %vm1679_vm12, %v1863_v14 }
 0x393 PF: > { %s23_s25 = sadd.s32 1, %s1998_s25  }
 0x394   : > { %p20_p4 = scmp.ge.s32.totalorder %s23_s25, 4  }
 0x396   :  { %22 = sbr.rel (!%p20_p4) target bundleno = 1 (0x1), region = 184 }

</bundles_post_ra>
